<compile_context>
chip_gen: v6e
topology: v6e:2x2x1
jax: 0.10.0
libtpu: 0.0.40
codegen_flags: <defaults>
</compile_context>

<pallas_src>
import jax
import jax.numpy as jnp
from jax.experimental import pallas as pl
from jax.experimental.pallas import tpu as pltpu


# --------------------------------------------------------------------------
# Pallas kernel
# --------------------------------------------------------------------------
def _instance_norm(x, eps):
    # Per-row (= per sample, per channel) normalization over the lane axis.
    # Single-pass stats: both reductions depend only on x (pipeline on XLU).
    mu = jnp.mean(x, axis=1, keepdims=True)
    m2 = jnp.mean(x * x, axis=1, keepdims=True)
    var = jnp.maximum(m2 - mu * mu, 0.0)
    return (x - mu) * jax.lax.rsqrt(var + eps)


def _cfs_kernel(xr_ref, xl_ref, cols_ref, w2_ref, wsq_ref, gamma_ref, out_ref):
    f32 = jnp.float32
    xr = xr_ref[...]                                   # [BC, W]
    xl = xl_ref[...]                                   # [BC, W]
    cols = cols_ref[...]                               # [BC, 16] packed columns
    BC = xr.shape[0]

    a1_s, a1_t = cols[:, 0:1], cols[:, 1:2]
    bq, bk, bv = cols[:, 2:3], cols[:, 3:4], cols[:, 4:5]
    r_s, r_t = cols[:, 5:6], cols[:, 6:7]
    l1_s, l1_t = cols[:, 7:8], cols[:, 8:9]
    l2_s, l2_t = cols[:, 9:10], cols[:, 10:11]
    l3_s, l3_t = cols[:, 11:12], cols[:, 12:13]

    # ---- att1: InstanceNorm(eps=1e-3) -> folded BN -> ReLU ----
    # (att1's 1x1 conv + bias are pre-multiplied into the k/v weights/biases)
    h = jnp.maximum(_instance_norm(xl, 1.0e-3) * a1_s + a1_t, 0.0)

    # ---- stacked MXU dots: [Wk';Wv'] @ h  and  [Wq; Wr_row] @ x_row ----
    kv = jnp.dot(w2_ref[0], h, preferred_element_type=f32)       # [2BC, W]
    qr = jnp.dot(w2_ref[1], xr, preferred_element_type=f32)      # [2BC, W]
    k = kv[:BC] + bk
    v = kv[BC:] + bv
    q = qr[:BC] + bq
    rr_row = qr[BC:]                                             # right-conv(x_row) half

    # ---- elementwise attention, softmax over the W (lane) axis ----
    att = q * k
    m = jnp.max(att, axis=1, keepdims=True)
    e = jnp.exp(att - m)
    s = e * pl.reciprocal(jnp.sum(e, axis=1, keepdims=True), approx=False)
    qv = s * v

    # ---- att2 = ResFormer_Block(cat([x_row, qv], channels), pre=True) ----
    # right: Conv(2C->C) split into x_row/qv halves (bias cancels in IN)
    rr = rr_row + jnp.dot(wsq_ref[0], qv, preferred_element_type=f32)
    x1 = _instance_norm(rr, 1.0e-5) * r_s + r_t
    # left0: IN only -- its BN affine is folded into left1's conv columns
    x0 = _instance_norm(x1, 1.0e-5)
    # left1: Conv -> IN -> BN ; relu ; + x1
    o1 = (_instance_norm(jnp.dot(wsq_ref[1], x0, preferred_element_type=f32),
                         1.0e-5) * l1_s + l1_t)
    o1 = jnp.maximum(o1, 0.0) + x1
    # left2: Conv -> IN -> BN ; relu ; + o1 + x1
    o2 = (_instance_norm(jnp.dot(wsq_ref[2], o1, preferred_element_type=f32),
                         1.0e-5) * l2_s + l2_t)
    o2 = jnp.maximum(o2, 0.0) + o1 + x1
    # left3: Conv -> IN -> BN ; relu(o3 + x1)
    o3 = (_instance_norm(jnp.dot(wsq_ref[3], o2, preferred_element_type=f32),
                         1.0e-5) * l3_s + l3_t)
    out_local = jnp.maximum(o3 + x1, 0.0)

    # ---- out = x_row + gamma1*out_local ; (out + mean_over_C(out)) * 0.5 ----
    out = xr + gamma_ref[0, 0] * out_local
    out_ref[...] = jnp.dot(wsq_ref[4], out, preferred_element_type=f32)


# --------------------------------------------------------------------------
# One-time parameter folding (cached at "model init", NOT on the call path).
# --------------------------------------------------------------------------
def _fold_bn(bn, eps=1.0e-5):
    g, b, rm, rv = bn
    s = g / jnp.sqrt(rv + eps)
    return s, b - rm * s


def prepare_cfs_params(p, B, C):
    """Fold BNs, pre-multiply convs, kron the batch, pack columns. Call once."""
    f32 = jnp.float32
    hi = jax.lax.Precision.HIGHEST
    eye_b = jnp.eye(B, dtype=f32)

    def kron_w(w):                    # [O, Cin] -> block-diagonal [B*O, B*Cin]
        return jnp.kron(eye_b, w.astype(f32))

    def col(v):                       # per-channel [C] -> batch-tiled [B*C]
        return jnp.tile(v.astype(f32), (B,))

    a1_s, a1_t = _fold_bn(p["att1_bn"])
    r_s, r_t = _fold_bn(p["right_bn"])
    l0_s, _l0_t = _fold_bn(p["left0_bn"])       # l0_t cancels in the next IN
    l1_s, l1_t = _fold_bn(p["left1_bn"])
    l2_s, l2_t = _fold_bn(p["left2_bn"])
    l3_s, l3_t = _fold_bn(p["left3_bn"])

    wa1, ba1 = p["att1_w"].astype(f32), p["att1_b"].astype(f32)
    wq, bq = p["q_w"].astype(f32), p["q_b"].astype(f32)
    wk, bk = p["k_w"].astype(f32), p["k_b"].astype(f32)
    wv, bv = p["v_w"].astype(f32), p["v_b"].astype(f32)

    # Pre-multiply att1's conv into k/v (exact: x_loc feeds only k and v).
    wk_f = jnp.dot(wk, wa1, precision=hi)
    bk_f = bk + jnp.dot(wk, ba1, precision=hi)
    wv_f = jnp.dot(wv, wa1, precision=hi)
    bv_f = bv + jnp.dot(wv, ba1, precision=hi)

    wr = p["right_w"].astype(f32)                 # [C, 2C]
    wr_row, wr_qv = wr[:, :C], wr[:, C:]

    # Fold left0's BN scale into left1's conv columns (bias part cancels).
    w1_f = p["l1_w"].astype(f32) * l0_s[None, :]

    # Stacked weight operands.
    w_kv = jnp.concatenate([kron_w(wk_f), kron_w(wv_f)], axis=0)    # [2BC, BC]
    w_qr = jnp.concatenate([kron_w(wq), kron_w(wr_row)], axis=0)    # [2BC, BC]
    w_big = jnp.stack([w_kv, w_qr])                                 # [2, 2BC, BC]

    # Final (out + mean over channels) * 0.5 as a single matrix.
    fin = 0.5 * (jnp.eye(B * C, dtype=f32)
                 + jnp.kron(eye_b, jnp.full((C, C), 1.0 / C, dtype=f32)))
    w_sq = jnp.stack([kron_w(wr_qv), kron_w(w1_f),
                      kron_w(p["l2_w"]), kron_w(p["l3_w"]), fin])   # [5, BC, BC]

    # Packed per-row columns: [BC, 16] (13 used, padded to 16 lanes).
    cols = jnp.stack([col(a1_s), col(a1_t), col(bq), col(bk_f), col(bv_f),
                      col(r_s), col(r_t), col(l1_s), col(l1_t),
                      col(l2_s), col(l2_t), col(l3_s), col(l3_t)], axis=1)
    cols = jnp.pad(cols, ((0, 0), (0, 16 - cols.shape[1])))

    gamma = p["gamma1"].astype(f32).reshape(1, 1)
    return dict(w_big=w_big, w_sq=w_sq, cols=cols, gamma=gamma)


# --------------------------------------------------------------------------
# Per-call path: reshape + one pallas_call. No parameter math here.
# --------------------------------------------------------------------------
def cfs_pallas(x_row, x_local, folded):
    """x_row, x_local: [B, C, 1, W] (NCHW with H == 1). Returns [B, C, 1, W]."""
    B, C, H, W = x_row.shape
    assert x_local.shape == (B, C, H, W)
    assert H == 1, "fused [B*C, W] layout assumes H == 1 (softmax axis == spatial)"
    # TODO(synk): H > 1 needs a (C*H, W) layout with per-channel IN stats.

    f32 = jnp.float32
    xr = x_row.astype(f32).reshape(B * C, W)
    xl = x_local.astype(f32).reshape(B * C, W)

    vmem = pltpu.MemorySpace.VMEM
    out = pl.pallas_call(
        _cfs_kernel,
        out_shape=jax.ShapeDtypeStruct((B * C, W), f32),
        in_specs=[
            pl.BlockSpec(memory_space=vmem),                    # x_row
            pl.BlockSpec(memory_space=vmem),                    # x_local
            pl.BlockSpec(memory_space=vmem),                    # packed columns
            pl.BlockSpec(memory_space=vmem),                    # stacked [2,2BC,BC]
            pl.BlockSpec(memory_space=vmem),                    # stacked [5,BC,BC]
            pl.BlockSpec(memory_space=pltpu.MemorySpace.SMEM),  # gamma (1,1)
        ],
        out_specs=pl.BlockSpec(memory_space=vmem),
    )(xr, xl, folded["cols"], folded["w_big"], folded["w_sq"], folded["gamma"])
    return out.reshape(B, C, H, W)


# --------------------------------------------------------------------------
# Pure-JAX reference mirroring the PyTorch module literally (eval-mode BN,
# un-folded params, conv biases included, explicit channel concat).
# --------------------------------------------------------------------------
def _in2d(x, eps):
    mu = jnp.mean(x, axis=(2, 3), keepdims=True)
    var = jnp.mean((x - mu) ** 2, axis=(2, 3), keepdims=True)
    return (x - mu) / jnp.sqrt(var + eps)


def _bn2d(x, bn, eps=1.0e-5):
    g, b, rm, rv = (a[None, :, None, None] for a in bn)
    return (x - rm) / jnp.sqrt(rv + eps) * g + b


def _conv1x1(x, w, b):
    y = jnp.einsum("oc,bchw->bohw", w, x, precision=jax.lax.Precision.HIGHEST)
    return y + b[None, :, None, None]


def cfs_reference(x_row, x_local, p):
    xr = x_row.astype(jnp.float32)
    xl = x_local.astype(jnp.float32)

    # att1
    h = jnp.maximum(_bn2d(_in2d(xl, 1.0e-3), p["att1_bn"]), 0.0)
    x_loc = _conv1x1(h, p["att1_w"], p["att1_b"])

    q = _conv1x1(xr, p["q_w"], p["q_b"])
    k = _conv1x1(x_loc, p["k_w"], p["k_b"])
    v = _conv1x1(x_loc, p["v_w"], p["v_b"])
    qv = jax.nn.softmax(q * k, axis=3) * v

    # att2 = ResFormer_Block(pre=True)
    x = jnp.concatenate([xr, qv], axis=1)
    x1 = _bn2d(_in2d(_conv1x1(x, p["right_w"], p["right_b"]), 1.0e-5), p["right_bn"])
    x0 = _bn2d(_in2d(x1, 1.0e-5), p["left0_bn"])
    o1 = _bn2d(_in2d(_conv1x1(x0, p["l1_w"], p["l1_b"]), 1.0e-5), p["left1_bn"])
    o1 = jnp.maximum(o1, 0.0) + x1
    o2 = _bn2d(_in2d(_conv1x1(o1, p["l2_w"], p["l2_b"]), 1.0e-5), p["left2_bn"])
    o2 = jnp.maximum(o2, 0.0) + o1 + x1
    o3 = _bn2d(_in2d(_conv1x1(o2, p["l3_w"], p["l3_b"]), 1.0e-5), p["left3_bn"])
    out_local = jnp.maximum(o3 + x1, 0.0)

    out = xr + p["gamma1"][0] * out_local
    return (out + jnp.mean(out, axis=1, keepdims=True)) * 0.5


# --------------------------------------------------------------------------
if __name__ == "__main__":
    # Small shapes consistent with the module: in_channel == out_channels == C
    # (required by the channel concat), NCHW spatial (H, W) = (1, 128).
    B, C, H, W = 2, 16, 1, 128

    keys = iter(jax.random.split(jax.random.PRNGKey(0), 64))
    nk = lambda: next(keys)

    def make_bn(c):
        return (1.0 + 0.1 * jax.random.normal(nk(), (c,), jnp.float32),    # gamma
                0.1 * jax.random.normal(nk(), (c,), jnp.float32),          # beta
                0.1 * jax.random.normal(nk(), (c,), jnp.float32),          # run mean
                0.5 + jnp.abs(jax.random.normal(nk(), (c,), jnp.float32))) # run var

    def make_conv(cout, cin):
        w = jax.random.normal(nk(), (cout, cin), jnp.float32) / jnp.sqrt(
            jnp.float32(cin))
        b = 0.1 * jax.random.normal(nk(), (cout,), jnp.float32)
        return w, b

    x_row = jax.random.normal(nk(), (B, C, H, W), jnp.float32)
    x_local = jax.random.normal(nk(), (B, C, H, W), jnp.float32)

    att1_w, att1_b = make_conv(C, C)
    q_w, q_b = make_conv(C, C)
    k_w, k_b = make_conv(C, C)
    v_w, v_b = make_conv(C, C)
    right_w, right_b = make_conv(C, 2 * C)
    l1_w, l1_b = make_conv(C, C)
    l2_w, l2_b = make_conv(C, C)
    l3_w, l3_b = make_conv(C, C)

    params = dict(
        att1_bn=make_bn(C), att1_w=att1_w, att1_b=att1_b,
        q_w=q_w, q_b=q_b, k_w=k_w, k_b=k_b, v_w=v_w, v_b=v_b,
        right_w=right_w, right_b=right_b, right_bn=make_bn(C),
        left0_bn=make_bn(C),
        l1_w=l1_w, l1_b=l1_b, left1_bn=make_bn(C),
        l2_w=l2_w, l2_b=l2_b, left2_bn=make_bn(C),
        l3_w=l3_w, l3_b=l3_b, left3_bn=make_bn(C),
        gamma1=1.0 + 0.1 * jax.random.normal(nk(), (1,), jnp.float32),
    )

    # Fold parameters ONCE (init-time), then the per-call path is just the
    # single pallas_call.
    folded = jax.tree_util.tree_map(jax.block_until_ready,
                                    prepare_cfs_params(params, B, C))

    forward = jax.jit(cfs_pallas)
    out = jax.block_until_ready(forward(x_row, x_local, folded))

    ref = cfs_reference(x_row, x_local, params)
    assert out.shape == (B, C, H, W)
    assert jnp.allclose(out, ref, atol=5e-4, rtol=5e-4)

    print("KERNEL_OK")
</pallas_src>

<mosaic_0001>
module attributes {stable_mosaic.version = 11 : i64} {
  func.func @_cfs_kernel(%arg0: memref<32x128xf32, #tpu.memory_space<vmem>>, %arg1: memref<32x128xf32, #tpu.memory_space<vmem>>, %arg2: memref<32x16xf32, #tpu.memory_space<vmem>>, %arg3: memref<2x64x32xf32, #tpu.memory_space<vmem>>, %arg4: memref<5x32x32xf32, #tpu.memory_space<vmem>>, %arg5: memref<1x1xf32, #tpu.memory_space<smem>>, %arg6: memref<32x128xf32, #tpu.memory_space<vmem>>) attributes {dimension_semantics = [], scalar_prefetch = 0 : i64, scratch_operands = 0 : i64, tpu.core_type = #tpu.core_type<tc>} {
    %c0 = arith.constant 0 : index
    %c0_0 = arith.constant 0 : index
    %0 = vector.load %arg0[%c0, %c0_0] : memref<32x128xf32, #tpu.memory_space<vmem>>, vector<32x128xf32>
    %c0_1 = arith.constant 0 : index
    %c0_2 = arith.constant 0 : index
    %1 = vector.load %arg1[%c0_1, %c0_2] : memref<32x128xf32, #tpu.memory_space<vmem>>, vector<32x128xf32>
    %c0_3 = arith.constant 0 : index
    %c0_4 = arith.constant 0 : index
    %2 = vector.load %arg2[%c0_3, %c0_4] : memref<32x16xf32, #tpu.memory_space<vmem>>, vector<32x16xf32>
    %3 = vector.extract_strided_slice %2 {offsets = [0, 0], sizes = [32, 1], strides = [1, 1]} : vector<32x16xf32> to vector<32x1xf32>
    %4 = vector.extract_strided_slice %2 {offsets = [0, 1], sizes = [32, 1], strides = [1, 1]} : vector<32x16xf32> to vector<32x1xf32>
    %5 = vector.extract_strided_slice %2 {offsets = [0, 2], sizes = [32, 1], strides = [1, 1]} : vector<32x16xf32> to vector<32x1xf32>
    %6 = vector.extract_strided_slice %2 {offsets = [0, 3], sizes = [32, 1], strides = [1, 1]} : vector<32x16xf32> to vector<32x1xf32>
    %7 = vector.extract_strided_slice %2 {offsets = [0, 4], sizes = [32, 1], strides = [1, 1]} : vector<32x16xf32> to vector<32x1xf32>
    %8 = vector.extract_strided_slice %2 {offsets = [0, 5], sizes = [32, 1], strides = [1, 1]} : vector<32x16xf32> to vector<32x1xf32>
    %9 = vector.extract_strided_slice %2 {offsets = [0, 6], sizes = [32, 1], strides = [1, 1]} : vector<32x16xf32> to vector<32x1xf32>
    %10 = vector.extract_strided_slice %2 {offsets = [0, 7], sizes = [32, 1], strides = [1, 1]} : vector<32x16xf32> to vector<32x1xf32>
    %11 = vector.extract_strided_slice %2 {offsets = [0, 8], sizes = [32, 1], strides = [1, 1]} : vector<32x16xf32> to vector<32x1xf32>
    %12 = vector.extract_strided_slice %2 {offsets = [0, 9], sizes = [32, 1], strides = [1, 1]} : vector<32x16xf32> to vector<32x1xf32>
    %13 = vector.extract_strided_slice %2 {offsets = [0, 10], sizes = [32, 1], strides = [1, 1]} : vector<32x16xf32> to vector<32x1xf32>
    %14 = vector.extract_strided_slice %2 {offsets = [0, 11], sizes = [32, 1], strides = [1, 1]} : vector<32x16xf32> to vector<32x1xf32>
    %15 = vector.extract_strided_slice %2 {offsets = [0, 12], sizes = [32, 1], strides = [1, 1]} : vector<32x16xf32> to vector<32x1xf32>
    %cst = arith.constant dense<0.000000e+00> : vector<32xf32>
    %16 = vector.multi_reduction <add>, %1, %cst [1] : vector<32x128xf32> to vector<32xf32>
    %17 = vector.shape_cast %16 : vector<32xf32> to vector<32x1xf32>
    %cst_5 = arith.constant 1.280000e+02 : f32
    %18 = vector.broadcast %cst_5 : f32 to vector<32x1xf32>
    %19 = arith.divf %17, %18 : vector<32x1xf32>
    %20 = arith.mulf %1, %1 : vector<32x128xf32>
    %cst_6 = arith.constant dense<0.000000e+00> : vector<32xf32>
    %21 = vector.multi_reduction <add>, %20, %cst_6 [1] : vector<32x128xf32> to vector<32xf32>
    %22 = vector.shape_cast %21 : vector<32xf32> to vector<32x1xf32>
    %cst_7 = arith.constant 1.280000e+02 : f32
    %23 = vector.broadcast %cst_7 : f32 to vector<32x1xf32>
    %24 = arith.divf %22, %23 : vector<32x1xf32>
    %25 = arith.mulf %19, %19 : vector<32x1xf32>
    %26 = arith.subf %24, %25 : vector<32x1xf32>
    %cst_8 = arith.constant 0.000000e+00 : f32
    %27 = vector.broadcast %cst_8 : f32 to vector<32x1xf32>
    %28 = arith.maximumf %26, %27 : vector<32x1xf32>
    %29 = vector.broadcast %19 : vector<32x1xf32> to vector<32x128xf32>
    %30 = arith.subf %1, %29 : vector<32x128xf32>
    %cst_9 = arith.constant 1.000000e-03 : f32
    %31 = vector.broadcast %cst_9 : f32 to vector<32x1xf32>
    %32 = arith.addf %28, %31 : vector<32x1xf32>
    %33 = math.rsqrt %32 : vector<32x1xf32>
    %34 = vector.broadcast %33 : vector<32x1xf32> to vector<32x128xf32>
    %35 = arith.mulf %30, %34 : vector<32x128xf32>
    %36 = vector.broadcast %3 : vector<32x1xf32> to vector<32x128xf32>
    %37 = arith.mulf %35, %36 : vector<32x128xf32>
    %38 = vector.broadcast %4 : vector<32x1xf32> to vector<32x128xf32>
    %39 = arith.addf %37, %38 : vector<32x128xf32>
    %cst_10 = arith.constant 0.000000e+00 : f32
    %40 = vector.broadcast %cst_10 : f32 to vector<32x128xf32>
    %41 = arith.maximumf %39, %40 : vector<32x128xf32>
    %c0_11 = arith.constant 0 : index
    %c0_12 = arith.constant 0 : index
    %c0_13 = arith.constant 0 : index
    %42 = vector.load %arg3[%c0_11, %c0_12, %c0_13] : memref<2x64x32xf32, #tpu.memory_space<vmem>>, vector<1x64x32xf32>
    %43 = vector.shape_cast %42 : vector<1x64x32xf32> to vector<64x32xf32>
    %cst_14 = arith.constant dense<0.000000e+00> : vector<64x128xf32>
    %44 = tpu.matmul %43, %41, %cst_14 {dimension_numbers = #tpu.dot_dimension_numbers<[1], [0], [0], [1], [0, 0, 1, 1], [], []>} : vector<64x32xf32>, vector<32x128xf32>, vector<64x128xf32> -> vector<64x128xf32>
    %c1 = arith.constant 1 : index
    %c0_15 = arith.constant 0 : index
    %c0_16 = arith.constant 0 : index
    %45 = vector.load %arg3[%c1, %c0_15, %c0_16] : memref<2x64x32xf32, #tpu.memory_space<vmem>>, vector<1x64x32xf32>
    %46 = vector.shape_cast %45 : vector<1x64x32xf32> to vector<64x32xf32>
    %cst_17 = arith.constant dense<0.000000e+00> : vector<64x128xf32>
    %47 = tpu.matmul %46, %0, %cst_17 {dimension_numbers = #tpu.dot_dimension_numbers<[1], [0], [0], [1], [0, 0, 1, 1], [], []>} : vector<64x32xf32>, vector<32x128xf32>, vector<64x128xf32> -> vector<64x128xf32>
    %48 = vector.extract_strided_slice %44 {offsets = [0, 0], sizes = [32, 128], strides = [1, 1]} : vector<64x128xf32> to vector<32x128xf32>
    %49 = vector.broadcast %6 : vector<32x1xf32> to vector<32x128xf32>
    %50 = arith.addf %48, %49 : vector<32x128xf32>
    %51 = vector.extract_strided_slice %44 {offsets = [32, 0], sizes = [32, 128], strides = [1, 1]} : vector<64x128xf32> to vector<32x128xf32>
    %52 = vector.broadcast %7 : vector<32x1xf32> to vector<32x128xf32>
    %53 = arith.addf %51, %52 : vector<32x128xf32>
    %54 = vector.extract_strided_slice %47 {offsets = [0, 0], sizes = [32, 128], strides = [1, 1]} : vector<64x128xf32> to vector<32x128xf32>
    %55 = vector.broadcast %5 : vector<32x1xf32> to vector<32x128xf32>
    %56 = arith.addf %54, %55 : vector<32x128xf32>
    %57 = vector.extract_strided_slice %47 {offsets = [32, 0], sizes = [32, 128], strides = [1, 1]} : vector<64x128xf32> to vector<32x128xf32>
    %58 = arith.mulf %56, %50 : vector<32x128xf32>
    %cst_18 = arith.constant dense<0xFF800000> : vector<32xf32>
    %59 = vector.multi_reduction <maximumf>, %58, %cst_18 [1] : vector<32x128xf32> to vector<32xf32>
    %60 = vector.shape_cast %59 : vector<32xf32> to vector<32x1xf32>
    %61 = vector.broadcast %60 : vector<32x1xf32> to vector<32x128xf32>
    %62 = arith.subf %58, %61 : vector<32x128xf32>
    %63 = math.exp %62 : vector<32x128xf32>
    %cst_19 = arith.constant dense<0.000000e+00> : vector<32xf32>
    %64 = vector.multi_reduction <add>, %63, %cst_19 [1] : vector<32x128xf32> to vector<32xf32>
    %65 = vector.shape_cast %64 : vector<32xf32> to vector<32x1xf32>
    %66 = tpu.reciprocal %65 : vector<32x1xf32> -> vector<32x1xf32>
    %67 = vector.broadcast %66 : vector<32x1xf32> to vector<32x128xf32>
    %68 = arith.mulf %63, %67 : vector<32x128xf32>
    %69 = arith.mulf %68, %53 : vector<32x128xf32>
    %c0_20 = arith.constant 0 : index
    %c0_21 = arith.constant 0 : index
    %c0_22 = arith.constant 0 : index
    %70 = vector.load %arg4[%c0_20, %c0_21, %c0_22] : memref<5x32x32xf32, #tpu.memory_space<vmem>>, vector<1x32x32xf32>
    %71 = vector.shape_cast %70 : vector<1x32x32xf32> to vector<32x32xf32>
    %cst_23 = arith.constant dense<0.000000e+00> : vector<32x128xf32>
    %72 = tpu.matmul %71, %69, %cst_23 {dimension_numbers = #tpu.dot_dimension_numbers<[1], [0], [0], [1], [0, 0, 1, 1], [], []>} : vector<32x32xf32>, vector<32x128xf32>, vector<32x128xf32> -> vector<32x128xf32>
    %73 = arith.addf %57, %72 : vector<32x128xf32>
    %cst_24 = arith.constant dense<0.000000e+00> : vector<32xf32>
    %74 = vector.multi_reduction <add>, %73, %cst_24 [1] : vector<32x128xf32> to vector<32xf32>
    %75 = vector.shape_cast %74 : vector<32xf32> to vector<32x1xf32>
    %cst_25 = arith.constant 1.280000e+02 : f32
    %76 = vector.broadcast %cst_25 : f32 to vector<32x1xf32>
    %77 = arith.divf %75, %76 : vector<32x1xf32>
    %78 = arith.mulf %73, %73 : vector<32x128xf32>
    %cst_26 = arith.constant dense<0.000000e+00> : vector<32xf32>
    %79 = vector.multi_reduction <add>, %78, %cst_26 [1] : vector<32x128xf32> to vector<32xf32>
    %80 = vector.shape_cast %79 : vector<32xf32> to vector<32x1xf32>
    %cst_27 = arith.constant 1.280000e+02 : f32
    %81 = vector.broadcast %cst_27 : f32 to vector<32x1xf32>
    %82 = arith.divf %80, %81 : vector<32x1xf32>
    %83 = arith.mulf %77, %77 : vector<32x1xf32>
    %84 = arith.subf %82, %83 : vector<32x1xf32>
    %cst_28 = arith.constant 0.000000e+00 : f32
    %85 = vector.broadcast %cst_28 : f32 to vector<32x1xf32>
    %86 = arith.maximumf %84, %85 : vector<32x1xf32>
    %87 = vector.broadcast %77 : vector<32x1xf32> to vector<32x128xf32>
    %88 = arith.subf %73, %87 : vector<32x128xf32>
    %cst_29 = arith.constant 9.99999974E-6 : f32
    %89 = vector.broadcast %cst_29 : f32 to vector<32x1xf32>
    %90 = arith.addf %86, %89 : vector<32x1xf32>
    %91 = math.rsqrt %90 : vector<32x1xf32>
    %92 = vector.broadcast %91 : vector<32x1xf32> to vector<32x128xf32>
    %93 = arith.mulf %88, %92 : vector<32x128xf32>
    %94 = vector.broadcast %8 : vector<32x1xf32> to vector<32x128xf32>
    %95 = arith.mulf %93, %94 : vector<32x128xf32>
    %96 = vector.broadcast %9 : vector<32x1xf32> to vector<32x128xf32>
    %97 = arith.addf %95, %96 : vector<32x128xf32>
    %cst_30 = arith.constant dense<0.000000e+00> : vector<32xf32>
    %98 = vector.multi_reduction <add>, %97, %cst_30 [1] : vector<32x128xf32> to vector<32xf32>
    %99 = vector.shape_cast %98 : vector<32xf32> to vector<32x1xf32>
    %cst_31 = arith.constant 1.280000e+02 : f32
    %100 = vector.broadcast %cst_31 : f32 to vector<32x1xf32>
    %101 = arith.divf %99, %100 : vector<32x1xf32>
    %102 = arith.mulf %97, %97 : vector<32x128xf32>
    %cst_32 = arith.constant dense<0.000000e+00> : vector<32xf32>
    %103 = vector.multi_reduction <add>, %102, %cst_32 [1] : vector<32x128xf32> to vector<32xf32>
    %104 = vector.shape_cast %103 : vector<32xf32> to vector<32x1xf32>
    %cst_33 = arith.constant 1.280000e+02 : f32
    %105 = vector.broadcast %cst_33 : f32 to vector<32x1xf32>
    %106 = arith.divf %104, %105 : vector<32x1xf32>
    %107 = arith.mulf %101, %101 : vector<32x1xf32>
    %108 = arith.subf %106, %107 : vector<32x1xf32>
    %cst_34 = arith.constant 0.000000e+00 : f32
    %109 = vector.broadcast %cst_34 : f32 to vector<32x1xf32>
    %110 = arith.maximumf %108, %109 : vector<32x1xf32>
    %111 = vector.broadcast %101 : vector<32x1xf32> to vector<32x128xf32>
    %112 = arith.subf %97, %111 : vector<32x128xf32>
    %cst_35 = arith.constant 9.99999974E-6 : f32
    %113 = vector.broadcast %cst_35 : f32 to vector<32x1xf32>
    %114 = arith.addf %110, %113 : vector<32x1xf32>
    %115 = math.rsqrt %114 : vector<32x1xf32>
    %116 = vector.broadcast %115 : vector<32x1xf32> to vector<32x128xf32>
    %117 = arith.mulf %112, %116 : vector<32x128xf32>
    %c1_36 = arith.constant 1 : index
    %c0_37 = arith.constant 0 : index
    %c0_38 = arith.constant 0 : index
    %118 = vector.load %arg4[%c1_36, %c0_37, %c0_38] : memref<5x32x32xf32, #tpu.memory_space<vmem>>, vector<1x32x32xf32>
    %119 = vector.shape_cast %118 : vector<1x32x32xf32> to vector<32x32xf32>
    %cst_39 = arith.constant dense<0.000000e+00> : vector<32x128xf32>
    %120 = tpu.matmul %119, %117, %cst_39 {dimension_numbers = #tpu.dot_dimension_numbers<[1], [0], [0], [1], [0, 0, 1, 1], [], []>} : vector<32x32xf32>, vector<32x128xf32>, vector<32x128xf32> -> vector<32x128xf32>
    %cst_40 = arith.constant dense<0.000000e+00> : vector<32xf32>
    %121 = vector.multi_reduction <add>, %120, %cst_40 [1] : vector<32x128xf32> to vector<32xf32>
    %122 = vector.shape_cast %121 : vector<32xf32> to vector<32x1xf32>
    %cst_41 = arith.constant 1.280000e+02 : f32
    %123 = vector.broadcast %cst_41 : f32 to vector<32x1xf32>
    %124 = arith.divf %122, %123 : vector<32x1xf32>
    %125 = arith.mulf %120, %120 : vector<32x128xf32>
    %cst_42 = arith.constant dense<0.000000e+00> : vector<32xf32>
    %126 = vector.multi_reduction <add>, %125, %cst_42 [1] : vector<32x128xf32> to vector<32xf32>
    %127 = vector.shape_cast %126 : vector<32xf32> to vector<32x1xf32>
    %cst_43 = arith.constant 1.280000e+02 : f32
    %128 = vector.broadcast %cst_43 : f32 to vector<32x1xf32>
    %129 = arith.divf %127, %128 : vector<32x1xf32>
    %130 = arith.mulf %124, %124 : vector<32x1xf32>
    %131 = arith.subf %129, %130 : vector<32x1xf32>
    %cst_44 = arith.constant 0.000000e+00 : f32
    %132 = vector.broadcast %cst_44 : f32 to vector<32x1xf32>
    %133 = arith.maximumf %131, %132 : vector<32x1xf32>
    %134 = vector.broadcast %124 : vector<32x1xf32> to vector<32x128xf32>
    %135 = arith.subf %120, %134 : vector<32x128xf32>
    %cst_45 = arith.constant 9.99999974E-6 : f32
    %136 = vector.broadcast %cst_45 : f32 to vector<32x1xf32>
    %137 = arith.addf %133, %136 : vector<32x1xf32>
    %138 = math.rsqrt %137 : vector<32x1xf32>
    %139 = vector.broadcast %138 : vector<32x1xf32> to vector<32x128xf32>
    %140 = arith.mulf %135, %139 : vector<32x128xf32>
    %141 = vector.broadcast %10 : vector<32x1xf32> to vector<32x128xf32>
    %142 = arith.mulf %140, %141 : vector<32x128xf32>
    %143 = vector.broadcast %11 : vector<32x1xf32> to vector<32x128xf32>
    %144 = arith.addf %142, %143 : vector<32x128xf32>
    %cst_46 = arith.constant 0.000000e+00 : f32
    %145 = vector.broadcast %cst_46 : f32 to vector<32x128xf32>
    %146 = arith.maximumf %144, %145 : vector<32x128xf32>
    %147 = arith.addf %146, %97 : vector<32x128xf32>
    %c2 = arith.constant 2 : index
    %c0_47 = arith.constant 0 : index
    %c0_48 = arith.constant 0 : index
    %148 = vector.load %arg4[%c2, %c0_47, %c0_48] : memref<5x32x32xf32, #tpu.memory_space<vmem>>, vector<1x32x32xf32>
    %149 = vector.shape_cast %148 : vector<1x32x32xf32> to vector<32x32xf32>
    %cst_49 = arith.constant dense<0.000000e+00> : vector<32x128xf32>
    %150 = tpu.matmul %149, %147, %cst_49 {dimension_numbers = #tpu.dot_dimension_numbers<[1], [0], [0], [1], [0, 0, 1, 1], [], []>} : vector<32x32xf32>, vector<32x128xf32>, vector<32x128xf32> -> vector<32x128xf32>
    %cst_50 = arith.constant dense<0.000000e+00> : vector<32xf32>
    %151 = vector.multi_reduction <add>, %150, %cst_50 [1] : vector<32x128xf32> to vector<32xf32>
    %152 = vector.shape_cast %151 : vector<32xf32> to vector<32x1xf32>
    %cst_51 = arith.constant 1.280000e+02 : f32
    %153 = vector.broadcast %cst_51 : f32 to vector<32x1xf32>
    %154 = arith.divf %152, %153 : vector<32x1xf32>
    %155 = arith.mulf %150, %150 : vector<32x128xf32>
    %cst_52 = arith.constant dense<0.000000e+00> : vector<32xf32>
    %156 = vector.multi_reduction <add>, %155, %cst_52 [1] : vector<32x128xf32> to vector<32xf32>
    %157 = vector.shape_cast %156 : vector<32xf32> to vector<32x1xf32>
    %cst_53 = arith.constant 1.280000e+02 : f32
    %158 = vector.broadcast %cst_53 : f32 to vector<32x1xf32>
    %159 = arith.divf %157, %158 : vector<32x1xf32>
    %160 = arith.mulf %154, %154 : vector<32x1xf32>
    %161 = arith.subf %159, %160 : vector<32x1xf32>
    %cst_54 = arith.constant 0.000000e+00 : f32
    %162 = vector.broadcast %cst_54 : f32 to vector<32x1xf32>
    %163 = arith.maximumf %161, %162 : vector<32x1xf32>
    %164 = vector.broadcast %154 : vector<32x1xf32> to vector<32x128xf32>
    %165 = arith.subf %150, %164 : vector<32x128xf32>
    %cst_55 = arith.constant 9.99999974E-6 : f32
    %166 = vector.broadcast %cst_55 : f32 to vector<32x1xf32>
    %167 = arith.addf %163, %166 : vector<32x1xf32>
    %168 = math.rsqrt %167 : vector<32x1xf32>
    %169 = vector.broadcast %168 : vector<32x1xf32> to vector<32x128xf32>
    %170 = arith.mulf %165, %169 : vector<32x128xf32>
    %171 = vector.broadcast %12 : vector<32x1xf32> to vector<32x128xf32>
    %172 = arith.mulf %170, %171 : vector<32x128xf32>
    %173 = vector.broadcast %13 : vector<32x1xf32> to vector<32x128xf32>
    %174 = arith.addf %172, %173 : vector<32x128xf32>
    %cst_56 = arith.constant 0.000000e+00 : f32
    %175 = vector.broadcast %cst_56 : f32 to vector<32x128xf32>
    %176 = arith.maximumf %174, %175 : vector<32x128xf32>
    %177 = arith.addf %176, %147 : vector<32x128xf32>
    %178 = arith.addf %177, %97 : vector<32x128xf32>
    %c3 = arith.constant 3 : index
    %c0_57 = arith.constant 0 : index
    %c0_58 = arith.constant 0 : index
    %179 = vector.load %arg4[%c3, %c0_57, %c0_58] : memref<5x32x32xf32, #tpu.memory_space<vmem>>, vector<1x32x32xf32>
    %180 = vector.shape_cast %179 : vector<1x32x32xf32> to vector<32x32xf32>
    %cst_59 = arith.constant dense<0.000000e+00> : vector<32x128xf32>
    %181 = tpu.matmul %180, %178, %cst_59 {dimension_numbers = #tpu.dot_dimension_numbers<[1], [0], [0], [1], [0, 0, 1, 1], [], []>} : vector<32x32xf32>, vector<32x128xf32>, vector<32x128xf32> -> vector<32x128xf32>
    %cst_60 = arith.constant dense<0.000000e+00> : vector<32xf32>
    %182 = vector.multi_reduction <add>, %181, %cst_60 [1] : vector<32x128xf32> to vector<32xf32>
    %183 = vector.shape_cast %182 : vector<32xf32> to vector<32x1xf32>
    %cst_61 = arith.constant 1.280000e+02 : f32
    %184 = vector.broadcast %cst_61 : f32 to vector<32x1xf32>
    %185 = arith.divf %183, %184 : vector<32x1xf32>
    %186 = arith.mulf %181, %181 : vector<32x128xf32>
    %cst_62 = arith.constant dense<0.000000e+00> : vector<32xf32>
    %187 = vector.multi_reduction <add>, %186, %cst_62 [1] : vector<32x128xf32> to vector<32xf32>
    %188 = vector.shape_cast %187 : vector<32xf32> to vector<32x1xf32>
    %cst_63 = arith.constant 1.280000e+02 : f32
    %189 = vector.broadcast %cst_63 : f32 to vector<32x1xf32>
    %190 = arith.divf %188, %189 : vector<32x1xf32>
    %191 = arith.mulf %185, %185 : vector<32x1xf32>
    %192 = arith.subf %190, %191 : vector<32x1xf32>
    %cst_64 = arith.constant 0.000000e+00 : f32
    %193 = vector.broadcast %cst_64 : f32 to vector<32x1xf32>
    %194 = arith.maximumf %192, %193 : vector<32x1xf32>
    %195 = vector.broadcast %185 : vector<32x1xf32> to vector<32x128xf32>
    %196 = arith.subf %181, %195 : vector<32x128xf32>
    %cst_65 = arith.constant 9.99999974E-6 : f32
    %197 = vector.broadcast %cst_65 : f32 to vector<32x1xf32>
    %198 = arith.addf %194, %197 : vector<32x1xf32>
    %199 = math.rsqrt %198 : vector<32x1xf32>
    %200 = vector.broadcast %199 : vector<32x1xf32> to vector<32x128xf32>
    %201 = arith.mulf %196, %200 : vector<32x128xf32>
    %202 = vector.broadcast %14 : vector<32x1xf32> to vector<32x128xf32>
    %203 = arith.mulf %201, %202 : vector<32x128xf32>
    %204 = vector.broadcast %15 : vector<32x1xf32> to vector<32x128xf32>
    %205 = arith.addf %203, %204 : vector<32x128xf32>
    %206 = arith.addf %205, %97 : vector<32x128xf32>
    %cst_66 = arith.constant 0.000000e+00 : f32
    %207 = vector.broadcast %cst_66 : f32 to vector<32x128xf32>
    %208 = arith.maximumf %206, %207 : vector<32x128xf32>
    %c0_67 = arith.constant 0 : index
    %c0_68 = arith.constant 0 : index
    %209 = memref.load %arg5[%c0_67, %c0_68] : memref<1x1xf32, #tpu.memory_space<smem>>
    %210 = vector.broadcast %209 : f32 to vector<32x128xf32>
    %211 = arith.mulf %210, %208 : vector<32x128xf32>
    %212 = arith.addf %0, %211 : vector<32x128xf32>
    %c4 = arith.constant 4 : index
    %c0_69 = arith.constant 0 : index
    %c0_70 = arith.constant 0 : index
    %213 = vector.load %arg4[%c4, %c0_69, %c0_70] : memref<5x32x32xf32, #tpu.memory_space<vmem>>, vector<1x32x32xf32>
    %214 = vector.shape_cast %213 : vector<1x32x32xf32> to vector<32x32xf32>
    %cst_71 = arith.constant dense<0.000000e+00> : vector<32x128xf32>
    %215 = tpu.matmul %214, %212, %cst_71 {dimension_numbers = #tpu.dot_dimension_numbers<[1], [0], [0], [1], [0, 0, 1, 1], [], []>} : vector<32x32xf32>, vector<32x128xf32>, vector<32x128xf32> -> vector<32x128xf32>
    %c0_72 = arith.constant 0 : index
    %c0_73 = arith.constant 0 : index
    %216 = vector.load %arg6[%c0_72, %c0_73] : memref<32x128xf32, #tpu.memory_space<vmem>>, vector<32x128xf32>
    tpu.vector_store %arg6[%c0_72, %c0_73], %215 {strides = array<i32>} : memref<32x128xf32, #tpu.memory_space<vmem>>, vector<32x128xf32>,
    return
  }
}

</mosaic_0001>

<bundles_post_ra>
// kernel: cfs_pallas.1
= control target key start
LH: loop header
LB: loop body
LE: loop exit
PB: predicated region body
PF: predicated region fallthrough
CT: control target
= control target key end

     0   :  { %v1929_v2 = vmov 0   ;;  %s2422_s0 = inlined_call_operand.vmem [shape: f32[32,128], index: 0, kind: input, shape index: {}]   ;;  %s2423_s1 = inlined_call_operand.vmem [shape: f32[32,128], index: 1, kind: input, shape index: {}]   ;;  %s2424_s2 = inlined_call_operand.vmem [shape: f32[32,16], index: 2, kind: input, shape index: {}]   ;;  %s2425_s3 = inlined_call_operand.vmem [shape: f32[2,64,32], index: 3, kind: input, shape index: {}]   ;;  %s2426_s4 = inlined_call_operand.vmem [shape: f32[5,32,32], index: 4, kind: input, shape index: {}]   ;;  %s2427_s5 = inlined_call_operand.<no memory space> [shape: f32[1,1], index: 5, kind: input, shape index: {}]   ;;  %s2428_s6 = inlined_call_operand.hbm [shape: f32[32,128], index: 6, kind: output, shape index: {}]  }
   0x1   :  { %v1983_v0 = vld [vmem:[%s2423_s1 + $0x18] sm:$0xff]  ;;  %1792 = vset.pattern.permute.xlu1 %v1929_v2  ;;  %v1991_v3 = vld [vmem:[%s2423_s1 + $0x10] sm:$0xff]  ;;  %1791 = vset.pattern.permute.xlu0 %v1929_v2 }
   0x2   :  { %43 = vadd.xlane.f32.xlu0 %v1983_v0  ;;  %v53_v1 = vmul.f32 %v1983_v0, %v1983_v0 }
   0x3   :  { %12 = vsyncpa [#allocation4], 0  ;;  %v1996_v4 = vld [vmem:[%s2423_s1 + $0x8] sm:$0xff]  ;;  %v52_v5 = vmul.f32 %v1991_v3, %v1991_v3  ;;  %v2005_v6 = vld [vmem:[%s2423_s1] sm:$0xff]  ;;  %v1930_v11 = vmov 1   ;;  %vm150_vm0 = vcmask 261120  }
   0x4   :  { %60 = vadd.xlane.f32.xlu1 %v53_v1  ;;  %v51_v7 = vmul.f32 %v1996_v4, %v1996_v4  ;;  %v50_v8 = vmul.f32 %v2005_v6, %v2005_v6  ;;  %v2015_v9 = vld [vmem:[%s2424_s2 + $0x10] sm:$0xff]  ;;  %v2021_v10 = vld [vmem:[%s2424_s2 + $0x18] sm:$0xff]  ;;  %v2028_v12 = vld [vmem:[%s2424_s2 + $0x8] sm:$0xff]  ;;  %v1931_v23 = vmov 3   ;;  %v1932_v24 = vmov 2  }
   0x5   :  { %v2035_v13 = vld [vmem:[%s2424_s2] sm:$0xff]  ;;  %v28_v14 = vld [vmem:[%s2422_s0 + $0x18] sm:$0xff]  ;;  %v27_v15 = vld [vmem:[%s2422_s0 + $0x10] sm:$0xff] }
   0x6   :  { %41 = vadd.xlane.f32.xlu0 %v1991_v3  ;;  %1677 = vmatprep.subr.mxu1 %v28_v14  ;;  %v26_v16 = vld [vmem:[%s2422_s0 + $0x8] sm:$0xff]  ;;  %v25_v17 = vld [vmem:[%s2422_s0] sm:$0xff]  ;;  %v1543_v20 = vld [vmem:[%s2425_s3 + $0x50] sm:$0xff] }
   0x7   :  { %1678 = vmatpush3.msra.mxu1 %v28_v14  ;;  %v1541_v18 = vld [vmem:[%s2425_s3 + $0x40] sm:$0xff]  ;;  %v1542_v19 = vld [vmem:[%s2425_s3 + $0x48] sm:$0xff]  ;;  %v1544_v22 = vld [vmem:[%s2425_s3 + $0x58] sm:$0xff] }
   0x8   :  { %39 = vadd.xlane.f32.xlu1 %v1996_v4  ;;  %1679 = vmatprep.subr.mxu1 %v27_v15  ;;  %v142_v21 = vld [vmem:[%s2425_s3] sm:$0xff] }
   0x9   :  { %1680 = vmatpush3.msra.mxu1 %v27_v15  ;;  %1685 = vmatprep.mubr.msk.f32.mxu1 %vm150_vm0, %v1541_v18 }
   0xa   :  { %58 = vadd.xlane.f32.xlu0 %v52_v5  ;;  %1681 = vmatprep.subr.mxu1 %v26_v16 }
   0xb   :  { %1682 = vmatpush3.msra.mxu1 %v26_v16  ;;  %1665 = vmatprep.mubr.msk.f32.mxu0 %vm150_vm0, %v142_v21 }
   0xc   :  { %37 = vadd.xlane.f32.xlu1 %v2005_v6  ;;  %1683 = vmatprep.subr.mxu1 %v25_v17 }
   0xd   :  { %1684 = vmatpush3.msra.mxu1 %v25_v17 }
   0xe   :  { %56 = vadd.xlane.f32.xlu0 %v51_v7  ;;  %1686 = vmatmul.mubr.msk.f32.vlgmr.msra.gmra.mxu1 %vm150_vm0, %v1542_v19 }
   0xf   :  { %1688 = vmatprep.mubr.msk.f32.mxu1 %vm150_vm0, %v1543_v20 }
  0x10   :  { %54 = vadd.xlane.f32.xlu1 %v50_v8 }
  0x12   :  { %1689 = vmatmul.mubr.msk.f32.gmra.mxu1 %vm150_vm0, %v1544_v22 }
  0x21   :  { %106 = vperm.xlu1 %1792, %v2015_v9  }
  0x24   :  { %111 = vperm.xlu0 %1791, %v2021_v10  }
  0x25   :  { %1793 = vset.pattern.permute.xlu1 %v1930_v11 }
  0x26   :  { %131 = vperm.xlu1 %1793, %v2021_v10  }
  0x28   :  { %1799 = vset.pattern.permute.xlu0 %v1932_v24 }
  0x29   :  { %471 = vperm.xlu0 %1799, %v2021_v10  }
  0x2a   :  { %1794 = vset.pattern.permute.xlu1 %v1929_v2 }
  0x2b   :  { %101 = vperm.xlu1 %1794, %v2028_v12  }
  0x2d   :  { %1801 = vset.pattern.permute.xlu0 %v1931_v23 }
  0x2e   :  { %423 = vperm.xlu0 %1801, %v2028_v12  }
  0x2f   :  { %1795 = vset.pattern.permute.xlu1 %v1930_v11 }
  0x30   :  { %127 = vperm.xlu1 %1795, %v2015_v9  }
  0x32   :  { %1803 = vset.pattern.permute.xlu0 %v1932_v24 }
  0x33   :  { %459 = vperm.xlu0 %1803, %v2035_v13  }
  0x34   :  { %1796 = vset.pattern.permute.xlu1 %v1929_v2 }
  0x35   :  { %96 = vperm.xlu1 %1796, %v2035_v13  }
  0x39   :  { %1797 = vset.pattern.permute.xlu1 %v1930_v11 }
  0x3a   :  { %123 = vperm.xlu1 %1797, %v2028_v12  }
  0x3e   :  { %119 = vperm.xlu1 %1797, %v2035_v13  }
  0x42   :  { %1798 = vset.pattern.permute.xlu1 %v1931_v23 }
  0x43   :  { %431 = vperm.xlu1 %1798, %v2021_v10  }
  0x47   :  { %427 = vperm.xlu1 %1798, %v2015_v9  }
  0x4b   :  { %1800 = vset.pattern.permute.xlu1 %v1932_v24 }
  0x4c   :  { %467 = vperm.xlu1 %1800, %v2015_v9  }
  0x50   :  { %463 = vperm.xlu1 %1800, %v2028_v12  }
  0x54   :  { %1802 = vset.pattern.permute.xlu1 %v1931_v23 }
  0x55   :  { %419 = vperm.xlu1 %1802, %v2035_v13  }
  0x8b   :  { %v44_v25 = vpop.xlane.xlu0 %43 }
  0x8c   :  { %v49_v26 = vmul.f32 0.0078125, %v44_v25 }
  0x8d   :  { %v61_v27 = vpop.xlane.xlu1 %60 }
  0x8e   :  { %v69_v28 = vmul.f32 %v49_v26, %v49_v26  ;;  %v65_v29 = vmul.f32 0.0078125, %v61_v27  ;;  %v81_v59 = vsub.f32 %v1983_v0, %v49_v26 }
  0x8f   :  { %v42_v30 = vpop.xlane.xlu0 %41 }
  0x90   :  { %v73_v31 = vsub.f32 %v65_v29, %v69_v28  ;;  %v48_v32 = vmul.f32 0.0078125, %v42_v30  ;;  %v143_v30 = vld [vmem:[%s2425_s3 + $0x8] sm:$0xff] }
  0x91   :  { %v40_v33 = vpop.xlane.xlu1 %39 }
  0x92   :  { %v77_v34 = vmax.f32 %v73_v31, 0.0  ;;  %v68_v35 = vmul.f32 %v48_v32, %v48_v32  ;;  %v47_v38 = vmul.f32 0.0078125, %v40_v33  ;;  %v80_v2 = vsub.f32 %v1991_v3, %v48_v32  ;;  %v145_v31 = vld [vmem:[%s2425_s3 + $0x18] sm:$0xff]  ;;  %v146_v32 = vld [vmem:[%s2425_s3 + $0x20] sm:$0xff]  ;;  %v147_v33 = vld [vmem:[%s2425_s3 + $0x28] sm:$0xff] }
  0x93   :  { %v59_v36 = vpop.xlane.xlu0 %58 }
  0x94   :  { %v85_v37 = vadd.f32 0.001, %v77_v34  ;;  %v64_v39 = vmul.f32 0.0078125, %v59_v36  ;;  %v67_v44 = vmul.f32 %v47_v38, %v47_v38  ;;  %v79_v17 = vsub.f32 %v1996_v4, %v47_v38  ;;  %v148_v34 = vld [vmem:[%s2425_s3 + $0x30] sm:$0xff]  ;;  %v149_v36 = vld [vmem:[%s2425_s3 + $0x38] sm:$0xff] }
  0x95   :  { %v38_v40 = vpop.xlane.xlu1 %37 }
  0x96   :  { %1835 = vrsqrt.f32 %v85_v37  ;;  %v72_v41 = vsub.f32 %v64_v39, %v68_v35  ;;  %v46_v42 = vmul.f32 0.0078125, %v38_v40  ;;  %v1933_v35 = vmov 4  }
  0x97   :  { %v57_v43 = vpop.xlane.xlu0 %56  ;;  %1804 = vset.pattern.permute.xlu1 %v1933_v35  ;;  %1805 = vset.pattern.permute.xlu0 %v1933_v35 }
  0x98   :  { %v76_v45 = vmax.f32 %v72_v41, 0.0  ;;  %v63_v46 = vmul.f32 0.0078125, %v57_v43  ;;  %v66_v49 = vmul.f32 %v46_v42, %v46_v42  ;;  %v78_v22 = vsub.f32 %v2005_v6, %v46_v42  ;;  %v144_v6 = vld [vmem:[%s2425_s3 + $0x10] sm:$0xff] }
  0x99   :  { %v55_v47 = vpop.xlane.xlu1 %54 }
  0x9a   :  { %v84_v48 = vadd.f32 0.001, %v76_v45  ;;  %v71_v50 = vsub.f32 %v63_v46, %v67_v44  ;;  %v62_v51 = vmul.f32 0.0078125, %v55_v47 }
  0x9c   :  { %1837 = vrsqrt.f32 %v84_v48  ;;  %v75_v52 = vmax.f32 %v71_v50, 0.0  ;;  %v70_v53 = vsub.f32 %v62_v51, %v66_v49 }
  0x9d   :  { %v107_v54 = vpop.permute.xlu1 %106 }
  0x9e   :  { %v83_v55 = vadd.f32 0.001, %v75_v52  ;;  %v74_v56 = vmax.f32 %v70_v53, 0.0 }
  0x9f   :  { %v112_v61 = vpop.permute.xlu0 %111 }
  0xa0   :  { %1839 = vrsqrt.f32 %v83_v55  ;;  %v82_v57 = vadd.f32 0.001, %v74_v56 }
  0xa1   :  { %v132_v58 = vpop.permute.xlu1 %131 }
  0xa2   :  { %1841 = vrsqrt.f32 %v82_v57 }
  0xa3   :  { %v1836_v60 = vpop.eup %1835 }
  0xa4   :  { %v93_v62 = vmul.f32 %v1836_v60, %v81_v59  ;;  %v472_v41 = vpop.permute.xlu0 %471 }
  0xa6   :  { %v117_v63 = vmul.f32 %v112_v61, %v93_v62  ;;  %v102_v1 = vpop.permute.xlu1 %101 }
  0xa8   :  { %v137_v5 = vadd.f32 %v132_v58, %v117_v63 }
  0xa9   :  { %v1838_v7 = vpop.eup %1837  ;;  %v424_v46 = vpop.permute.xlu0 %423 }
  0xaa   :  { %v92_v8 = vmul.f32 %v1838_v7, %v80_v2  ;;  %v141_v11 = vmax.f32 %v137_v5, 0.0 }
  0xab   :  { %v128_v14 = vpop.permute.xlu1 %127 }
  0xac   :  { %v116_v15 = vmul.f32 %v107_v54, %v92_v8  ;;  %1657 = vmatprep.subr.mxu0 %v141_v11 }
  0xad   :  { %v1840_v16 = vpop.eup %1839  ;;  %1658 = vmatpush3.msra.mxu0 %v141_v11 }
  0xae   :  { %v136_v0 = vadd.f32 %v128_v14, %v116_v15  ;;  %v91_v18 = vmul.f32 %v1840_v16, %v79_v17  ;;  %v460_v59 = vpop.permute.xlu0 %459 }
  0xaf   :  { %v1842_v21 = vpop.eup %1841 }
  0xb0   :  { %v140_v19 = vmax.f32 %v136_v0, 0.0  ;;  %v97_v20 = vpop.permute.xlu1 %96  ;;  %v115_v3 = vmul.f32 %v102_v1, %v91_v18  ;;  %v90_v23 = vmul.f32 %v1842_v21, %v78_v22 }
  0xb2   :  { %1659 = vmatprep.subr.mxu0 %v140_v19  ;;  %v114_v26 = vmul.f32 %v97_v20, %v90_v23  ;;  %v1545_v23 = vld [vmem:[%s2425_s3 + $0x60] sm:$0xff] }
  0xb3   :  { %1660 = vmatpush3.msra.mxu0 %v140_v19  ;;  %1691 = vmatprep.mubr.msk.f32.mxu1 %vm150_vm0, %v1545_v23 }
  0xb5   :  { %v124_v24 = vpop.permute.xlu1 %123 }
  0xb6   :  { %v135_v25 = vadd.f32 %v124_v24, %v115_v3  ;;  %v1546_v24 = vld [vmem:[%s2425_s3 + $0x68] sm:$0xff] }
  0xb7   :  { %1692 = vmatmul.mubr.msk.f32.gmra.mxu1 %vm150_vm0, %v1546_v24 }
  0xb8   :  { %v139_v27 = vmax.f32 %v135_v25, 0.0  ;;  %v522_v25 = vld [vmem:[%s2426_s4] sm:$0xff] }
  0xb9   :  { %v120_v28 = vpop.permute.xlu1 %119 }
  0xba   :  { %v134_v29 = vadd.f32 %v120_v28, %v114_v26  ;;  %1661 = vmatprep.subr.mxu0 %v139_v27  ;;  %v1547_v26 = vld [vmem:[%s2425_s3 + $0x70] sm:$0xff] }
  0xbb   :  { %1662 = vmatpush3.msra.mxu0 %v139_v27  ;;  %1694 = vmatprep.mubr.msk.f32.mxu1 %vm150_vm0, %v1547_v26  ;;  %v1548_v27 = vld [vmem:[%s2425_s3 + $0x78] sm:$0xff] }
  0xbc   :  { %v138_v4 = vmax.f32 %v134_v29, 0.0  ;;  %1695 = vmatmul.mubr.msk.f32.gmra.mxu1 %vm150_vm0, %v1548_v27 }
  0xbe   :  { %1663 = vmatprep.subr.mxu0 %v138_v4  ;;  %v432_v37 = vpop.permute.xlu1 %431 }
  0xbf   :  { %1664 = vmatpush3.msra.mxu0 %v138_v4 }
  0xc0   :  { %1666 = vmatmul.mubr.msk.f32.vlgmr.msra.gmra.mxu0 %vm150_vm0, %v143_v30 }
  0xc1   :  { %1668 = vmatprep.mubr.msk.f32.mxu0 %vm150_vm0, %v144_v6 }
  0xc2   :  { %v428_v38 = vpop.permute.xlu1 %427 }
  0xc4   :  { %1669 = vmatmul.mubr.msk.f32.gmra.mxu0 %vm150_vm0, %v145_v31 }
  0xc5   :  { %1671 = vmatprep.mubr.msk.f32.mxu0 %vm150_vm0, %v146_v32 }
  0xc7   :  { %v468_v40 = vpop.permute.xlu1 %467 }
  0xc8   :  { %1672 = vmatmul.mubr.msk.f32.gmra.mxu0 %vm150_vm0, %v147_v33 }
  0xc9   :  { %1674 = vmatprep.mubr.msk.f32.mxu0 %vm150_vm0, %v148_v34 }
  0xcb   :  { %v464_v43 = vpop.permute.xlu1 %463 }
  0xcc   :  { %1675 = vmatmul.mubr.msk.f32.gmra.mxu0 %vm150_vm0, %v149_v36 }
  0xcd   :  { %1705 = vmatprep.mubr.msk.f32.mxu0 %vm150_vm0, %v522_v25 }
  0xce   :  { %v1687_v39 = vpop.f32.mrf.mxu1 }
  0xcf   :  { %v475_v52 = vadd.f32 %v1687_v39, %v464_v43 }
  0xd0   :  { %v379_v42 = vpop.f32.mrf.mxu1  ;;  %v420_v53 = vpop.permute.xlu1 %419 }
  0xd1   :  { %v474_v62 = vadd.f32 %v460_v59, %v379_v42 }
  0xd2   :  { %v1690_v45 = vpop.f32.mrf.mxu1 }
  0xd3   :  { %v477_v50 = vadd.f32 %v1690_v45, %v472_v41 }
  0xd4   :  { %v389_v48 = vpop.f32.mrf.mxu1 }
  0xd5   :  { %v476_v56 = vadd.f32 %v468_v40, %v389_v48 }
 0x180   :  { %v1667_v44 = vpop.f32.mrf.mxu0 }
 0x181   :  { %v435_v55 = vadd.f32 %v1667_v44, %v424_v46 }
 0x182   :  { %v241_v47 = vpop.f32.mrf.mxu0 }
 0x183   :  { %v434_v60 = vadd.f32 %v420_v53, %v241_v47  ;;  %v479_v63 = vmul.f32 %v475_v52, %v435_v55  ;;  %v524_v55 = vld [vmem:[%s2426_s4 + $0x10] sm:$0xff] }
 0x184   :  { %v1670_v49 = vpop.f32.mrf.mxu0 }
 0x185   :  { %v437_v51 = vadd.f32 %v1670_v49, %v432_v37  ;;  %v478_v1 = vmul.f32 %v474_v62, %v434_v60 }
 0x186   :  { %v251_v54 = vpop.f32.mrf.mxu0 }
 0x187   :  { %v436_v57 = vadd.f32 %v428_v38, %v251_v54  ;;  %v481_v58 = vmul.f32 %v477_v50, %v437_v51  ;;  %v523_v54 = vld [vmem:[%s2426_s4 + $0x8] sm:$0xff] }
 0x188   :  { %v1673_v31 = vpop.f32.mrf.mxu0 }
 0x189   :  { %488 = vmax.xlane.f32.xlu1 %v481_v58  ;;  %v480_v61 = vmul.f32 %v476_v56, %v436_v57  ;;  %v525_v56 = vld [vmem:[%s2426_s4 + $0x18] sm:$0xff]  ;;  %v1934_v57 = vmov 5  }
 0x18a   :  { %v261_v32 = vpop.f32.mrf.mxu0 }
 0x18b   :  { %486 = vmax.xlane.f32.xlu0 %v480_v61 }
 0x18c   :  { %v1676_v33 = vpop.f32.mrf.mxu0 }
 0x18d   :  { %484 = vmax.xlane.f32.xlu1 %v479_v63 }
 0x18e   :  { %v271_v37 = vpop.f32.mrf.mxu0 }
 0x18f   :  { %482 = vmax.xlane.f32.xlu0 %v478_v1 }
 0x19e   :  { %451 = vperm.xlu1 %1804, %v2021_v10  }
 0x212   :  { %v489_v2 = vpop.xlane.xlu1 %488 }
 0x213   :  { %v493_v8 = vsub.f32 %v481_v58, %v489_v2  ;;  %v1693_v58 = vpop.f32.mrf.mxu1 }
 0x214   :  { %v487_v5 = vpop.xlane.xlu0 %486 }
 0x215   :  { %v492_v15 = vsub.f32 %v480_v61, %v487_v5  ;;  %v500_v0 = vmul.f32 1.442695, %v493_v8  ;;  %v399_v59 = vpop.f32.mrf.mxu1 }
 0x216   :  { %v485_v7 = vpop.xlane.xlu1 %484 }
 0x217   :  { %v491_v11 = vsub.f32 %v479_v63, %v485_v7  ;;  %v498_v19 = vmul.f32 1.442695, %v492_v15  ;;  %v1696_v61 = vpop.f32.mrf.mxu1 }
 0x218   :  { %v483_v14 = vpop.xlane.xlu0 %482 }
 0x219   :  { %v496_v16 = vmul.f32 1.442695, %v491_v11  ;;  %v490_v17 = vsub.f32 %v478_v1, %v483_v14  ;;  %v409_v5 = vpop.f32.mrf.mxu1 }
 0x21a   :  { %v452_v28 = vpop.permute.xlu1 %451 }
 0x21b   :  { %1843 = vpow2.f32 %v496_v16  ;;  %v494_v18 = vmul.f32 1.442695, %v490_v17  ;;  %v457_v40 = vadd.f32 %v1676_v33, %v452_v28  ;;  %v1935_v16 = vmov 6  }
 0x21d   :  { %1845 = vpow2.f32 %v494_v18 }
 0x21e   :  { %1847 = vpow2.f32 %v500_v0 }
 0x21f   :  { %1849 = vpow2.f32 %v498_v19 }
 0x228   :  { %v1844_v20 = vpop.eup %1843 }
 0x229   :  { %504 = vadd.xlane.f32.xlu1 %v1844_v20 }
 0x22a   :  { %v1846_v21 = vpop.eup %1845 }
 0x22b   :  { %502 = vadd.xlane.f32.xlu0 %v1846_v21  ;;  %v1848_v22 = vpop.eup %1847 }
 0x22c   :  { %v1850_v3 = vpop.eup %1849 }
 0x22d   :  { %508 = vadd.xlane.f32.xlu1 %v1848_v22 }
 0x22f   :  { %506 = vadd.xlane.f32.xlu0 %v1850_v3 }
 0x23e   :  { %443 = vperm.xlu1 %1804, %v2028_v12  }
 0x242   :  { %439 = vperm.xlu1 %1804, %v2035_v13  }
 0x245   :  { %447 = vperm.xlu0 %1805, %v2015_v9  }
 0x246   :  { %1807 = vset.pattern.permute.xlu1 %v1934_v57 }
 0x249   :  { %1806 = vset.pattern.permute.xlu0 %v1934_v57 }
 0x2b2   :  { %v505_v29 = vpop.xlane.xlu1 %504 }
 0x2b3   :  { %1851 = vrcp.f32 %v505_v29 }
 0x2b4   :  { %v503_v4 = vpop.xlane.xlu0 %502 }
 0x2b6   :  { %v509_v30 = vpop.xlane.xlu1 %508 }
 0x2b7   :  { %1853 = vrcp.f32 %v509_v30 }
 0x2b8   :  { %1855 = vrcp.f32 %v503_v4  ;;  %v507_v6 = vpop.xlane.xlu0 %506 }
 0x2b9   :  { %1857 = vrcp.f32 %v507_v6 }
 0x2ba   :  { %v444_v34 = vpop.permute.xlu1 %443 }
 0x2bb   :  { %v455_v48 = vadd.f32 %v1673_v31, %v444_v34 }
 0x2be   :  { %v440_v47 = vpop.permute.xlu1 %439 }
 0x2bf   :  { %v454_v52 = vadd.f32 %v440_v47, %v261_v32 }
 0x2c0   :  { %v1852_v35 = vpop.eup %1851  ;;  %v448_v38 = vpop.permute.xlu0 %447 }
 0x2c1   :  { %v515_v43 = vmul.f32 %v1852_v35, %v1844_v20  ;;  %v456_v45 = vadd.f32 %v448_v38, %v271_v37 }
 0x2c3   :  { %v519_v51 = vmul.f32 %v515_v43, %v455_v48 }
 0x2c4   :  { %v1854_v36 = vpop.eup %1853 }
 0x2c5   :  { %v1856_v39 = vpop.eup %1855  ;;  %v517_v41 = vmul.f32 %v1854_v36, %v1848_v22 }
 0x2c6   :  { %v1858_v42 = vpop.eup %1857  ;;  %v514_v49 = vmul.f32 %v1856_v39, %v1846_v21 }
 0x2c7   :  { %v516_v44 = vmul.f32 %v1858_v42, %v1850_v3  ;;  %v521_v46 = vmul.f32 %v517_v41, %v457_v40 }
 0x2c8   :  { %v518_v53 = vmul.f32 %v514_v49, %v454_v52 }
 0x2c9   :  { %v520_v50 = vmul.f32 %v516_v44, %v456_v45  ;;  %1697 = vmatprep.subr.mxu0 %v521_v46 }
 0x2ca   :  { %1698 = vmatpush3.msra.mxu0 %v521_v46 }
 0x2cb   :  { %1699 = vmatprep.subr.mxu0 %v520_v50 }
 0x2cc   :  { %1700 = vmatpush3.msra.mxu0 %v520_v50 }
 0x2cd   :  { %1701 = vmatprep.subr.mxu0 %v519_v51 }
 0x2ce   :  { %1702 = vmatpush3.msra.mxu0 %v519_v51 }
 0x2cf   :  { %1703 = vmatprep.subr.mxu0 %v518_v53 }
 0x2d0   :  { %1704 = vmatpush3.msra.mxu0 %v518_v53 }
 0x2d1   :  { %1706 = vmatmul.mubr.msk.f32.vlgmr.msra.gmra.mxu0 %vm150_vm0, %v523_v54 }
 0x2d2   :  { %1708 = vmatprep.mubr.msk.f32.mxu0 %vm150_vm0, %v524_v55 }
 0x2d5   :  { %1709 = vmatmul.mubr.msk.f32.gmra.mxu0 %vm150_vm0, %v525_v56 }
 0x391   :  { %v1707_v60 = vpop.f32.mrf.mxu0 }
 0x392   :  { %v2148_v62 = vadd.f32 %v1707_v60, %v1693_v58 }
 0x393   :  { %v604_v63 = vpop.f32.mrf.mxu0 }
 0x394   :  { %629 = vadd.xlane.f32.xlu1 %v2148_v62  ;;  %v640_v1 = vmul.f32 %v2148_v62, %v2148_v62  ;;  %v2153_v7 = vadd.f32 %v604_v63, %v399_v59 }
 0x395   :  { %v1710_v2 = vpop.f32.mrf.mxu0 }
 0x396   :  { %645 = vadd.xlane.f32.xlu0 %v640_v1  ;;  %v2155_v11 = vadd.f32 %v1710_v2, %v1696_v61  ;;  %v639_v15 = vmul.f32 %v2153_v7, %v2153_v7 }
 0x397   :  { %v614_v8 = vpop.f32.mrf.mxu0 }
 0x398   :  { %v2157_v14 = vadd.f32 %v614_v8, %v409_v5  ;;  %627 = vadd.xlane.f32.xlu1 %v2153_v7  ;;  %v642_v17 = vmul.f32 %v2155_v11, %v2155_v11 }
 0x39a   :  { %631 = vadd.xlane.f32.xlu0 %v2157_v14  ;;  %v641_v0 = vmul.f32 %v2157_v14, %v2157_v14 }
 0x39c   :  { %633 = vadd.xlane.f32.xlu1 %v2155_v11 }
 0x3a0   :  { %643 = vadd.xlane.f32.xlu1 %v639_v15 }
 0x3b0   :  { %696 = vperm.xlu0 %1806, %v2021_v10  }
 0x3b1   :  { %692 = vperm.xlu1 %1807, %v2015_v9  }
 0x3b5   :  { %1808 = vset.pattern.permute.xlu1 %v1935_v16 }
 0x3b6   :  { %716 = vperm.xlu1 %1808, %v2021_v10  }
 0x3ba   :  { %1809 = vset.pattern.permute.xlu1 %v1934_v57 }
 0x3bb   :  { %688 = vperm.xlu1 %1809, %v2028_v12  }
 0x3bf   :  { %1810 = vset.pattern.permute.xlu1 %v1935_v16 }
 0x3c0   :  { %712 = vperm.xlu1 %1810, %v2015_v9  }
 0x3c4   :  { %1811 = vset.pattern.permute.xlu1 %v1934_v57 }
 0x3c5   :  { %684 = vperm.xlu1 %1811, %v2035_v13  }
 0x3c9   :  { %1812 = vset.pattern.permute.xlu1 %v1935_v16 }
 0x3e9   :  { %649 = vadd.xlane.f32.xlu1 %v642_v17 }
 0x3ed   :  { %647 = vadd.xlane.f32.xlu1 %v641_v0 }
 0x3fe   :  { %708 = vperm.xlu1 %1812, %v2028_v12  }
 0x402   :  { %704 = vperm.xlu1 %1812, %v2035_v13  }
 0x41d   :  { %v630_v18 = vpop.xlane.xlu1 %629 }
 0x41e   :  { %v636_v22 = vmul.f32 0.0078125, %v630_v18 }
 0x41f   :  { %v646_v3 = vpop.xlane.xlu0 %645 }
 0x420   :  { %v656_v23 = vmul.f32 %v636_v22, %v636_v22  ;;  %v652_v24 = vmul.f32 0.0078125, %v646_v3  ;;  %v668_v40 = vsub.f32 %v2148_v62, %v636_v22  ;;  %v1561_v22 = vld [vmem:[%s2426_s4 + $0x20] sm:$0xff] }
 0x421   :  { %v628_v19 = vpop.xlane.xlu1 %627  ;;  %1719 = vmatprep.mubr.msk.f32.mxu1 %vm150_vm0, %v1561_v22 }
 0x422   :  { %v660_v26 = vsub.f32 %v652_v24, %v656_v23  ;;  %v635_v30 = vmul.f32 0.0078125, %v628_v19 }
 0x423   :  { %v632_v37 = vpop.xlane.xlu0 %631 }
 0x424   :  { %v664_v28 = vmax.f32 %v660_v26, 0.0  ;;  %v655_v32 = vmul.f32 %v635_v30, %v635_v30  ;;  %v637_v43 = vmul.f32 0.0078125, %v632_v37  ;;  %v667_v62 = vsub.f32 %v2153_v7, %v635_v30 }
 0x425   :  { %v634_v20 = vpop.xlane.xlu1 %633 }
 0x426   :  { %v672_v29 = vadd.f32 1e-05, %v664_v28  ;;  %v638_v35 = vmul.f32 0.0078125, %v634_v20  ;;  %v657_v48 = vmul.f32 %v637_v43, %v637_v43  ;;  %v669_v1 = vsub.f32 %v2157_v14, %v637_v43 }
 0x428   :  { %1859 = vrsqrt.f32 %v672_v29  ;;  %v658_v41 = vmul.f32 %v638_v35, %v638_v35  ;;  %v670_v59 = vsub.f32 %v2155_v11, %v638_v35 }
 0x429   :  { %v644_v21 = vpop.xlane.xlu1 %643 }
 0x42a   :  { %v651_v31 = vmul.f32 0.0078125, %v644_v21 }
 0x42b   :  { %v697_v61 = vpop.permute.xlu0 %696 }
 0x42c   :  { %v659_v33 = vsub.f32 %v651_v31, %v655_v32 }
 0x42d   :  { %v693_v25 = vpop.permute.xlu1 %692 }
 0x42e   :  { %v663_v38 = vmax.f32 %v659_v33, 0.0 }
 0x430   :  { %v671_v46 = vadd.f32 1e-05, %v663_v38 }
 0x431   :  { %v717_v27 = vpop.permute.xlu1 %716 }
 0x432   :  { %1861 = vrsqrt.f32 %v671_v46 }
 0x435   :  { %v1860_v36 = vpop.eup %1859 }
 0x436   :  { %v689_v4 = vpop.permute.xlu1 %688  ;;  %v680_v44 = vmul.f32 %v1860_v36, %v668_v40 }
 0x438   :  { %v700_v51 = vmul.f32 %v689_v4, %v680_v44 }
 0x43b   :  { %v713_v6 = vpop.permute.xlu1 %712 }
 0x43f   :  { %v1862_v58 = vpop.eup %1861 }
 0x440   :  { %v685_v34 = vpop.permute.xlu1 %684  ;;  %v679_v2 = vmul.f32 %v1862_v58, %v667_v62 }
 0x442   :  { %v699_v0 = vmul.f32 %v685_v34, %v679_v2  ;;  %v1562_v2 = vld [vmem:[%s2426_s4 + $0x28] sm:$0xff] }
 0x472   :  { %v650_v39 = vpop.xlane.xlu1 %649 }
 0x473   :  { %v654_v42 = vmul.f32 0.0078125, %v650_v39 }
 0x475   :  { %v662_v45 = vsub.f32 %v654_v42, %v658_v41 }
 0x476   :  { %v648_v47 = vpop.xlane.xlu1 %647 }
 0x477   :  { %v666_v49 = vmax.f32 %v662_v45, 0.0  ;;  %v653_v50 = vmul.f32 0.0078125, %v648_v47 }
 0x479   :  { %v674_v52 = vadd.f32 1e-05, %v666_v49  ;;  %v661_v53 = vsub.f32 %v653_v50, %v657_v48 }
 0x47a   :  { %v709_v54 = vpop.permute.xlu1 %708 }
 0x47b   :  { %1863 = vrsqrt.f32 %v674_v52  ;;  %v665_v55 = vmax.f32 %v661_v53, 0.0  ;;  %v2177_v56 = vadd.f32 %v709_v54, %v700_v51 }
 0x47d   :  { %v673_v57 = vadd.f32 1e-05, %v665_v55  ;;  %725 = vadd.xlane.f32.xlu1 %v2177_v56  ;;  %v736_v21 = vmul.f32 %v2177_v56, %v2177_v56 }
 0x47e   :  { %v705_v17 = vpop.permute.xlu1 %704 }
 0x47f   :  { %1865 = vrsqrt.f32 %v673_v57  ;;  %v2186_v19 = vadd.f32 %v705_v17, %v699_v0 }
 0x481   :  { %v735_v14 = vmul.f32 %v2186_v19, %v2186_v19 }
 0x488   :  { %v1864_v60 = vpop.eup %1863 }
 0x489   :  { %v682_v63 = vmul.f32 %v1864_v60, %v670_v59 }
 0x48b   :  { %v702_v5 = vmul.f32 %v697_v61, %v682_v63 }
 0x48c   :  { %v1866_v8 = vpop.eup %1865 }
 0x48d   :  { %v681_v15 = vmul.f32 %v1866_v8, %v669_v1  ;;  %v2183_v16 = vadd.f32 %v717_v27, %v702_v5  ;;  %v1563_v5 = vld [vmem:[%s2426_s4 + $0x30] sm:$0xff]  ;;  %v1564_v8 = vld [vmem:[%s2426_s4 + $0x38] sm:$0xff] }
 0x48f   :  { %729 = vadd.xlane.f32.xlu1 %v2183_v16  ;;  %v701_v18 = vmul.f32 %v693_v25, %v681_v15  ;;  %v738_v7 = vmul.f32 %v2183_v16, %v2183_v16  ;;  %v1936_v15 = vmov 7  }
 0x490   :  { %1814 = vset.pattern.permute.xlu1 %v1936_v15  ;;  %1813 = vset.pattern.permute.xlu0 %v1936_v15 }
 0x491   :  { %v2188_v11 = vadd.f32 %v713_v6, %v701_v18 }
 0x493   :  { %727 = vadd.xlane.f32.xlu0 %v2188_v11  ;;  %723 = vadd.xlane.f32.xlu1 %v2186_v19  ;;  %v737_v20 = vmul.f32 %v2188_v11, %v2188_v11 }
 0x497   :  { %745 = vadd.xlane.f32.xlu0 %v738_v7  ;;  %739 = vadd.xlane.f32.xlu1 %v735_v14 }
 0x49b   :  { %743 = vadd.xlane.f32.xlu0 %v737_v20 }
 0x49f   :  { %741 = vadd.xlane.f32.xlu0 %v736_v21 }
 0x506   :  { %v726_v3 = vpop.xlane.xlu1 %725 }
 0x507   :  { %v732_v36 = vmul.f32 0.0078125, %v726_v3  ;;  %v1937_v3 = vmov 8  }
 0x509   :  { %v752_v44 = vmul.f32 %v732_v36, %v732_v36  ;;  %v764_v60 = vsub.f32 %v2177_v56, %v732_v36 }
 0x518   :  { %v730_v23 = vpop.xlane.xlu1 %729 }
 0x519   :  { %v734_v26 = vmul.f32 0.0078125, %v730_v23  ;;  %v1569_v23 = vld [vmem:[%s2426_s4 + $0x40] sm:$0xff] }
 0x51a   :  { %1733 = vmatprep.mubr.msk.f32.mxu0 %vm150_vm0, %v1569_v23 }
 0x51b   :  { %v754_v4 = vmul.f32 %v734_v26, %v734_v26  ;;  %v766_v52 = vsub.f32 %v2183_v16, %v734_v26 }
 0x51c   :  { %v728_v24 = vpop.xlane.xlu0 %727  ;;  %v724_v25 = vpop.xlane.xlu1 %723 }
 0x51d   :  { %v731_v27 = vmul.f32 0.0078125, %v724_v25  ;;  %v733_v30 = vmul.f32 0.0078125, %v728_v24 }
 0x51f   :  { %v751_v32 = vmul.f32 %v731_v27, %v731_v27  ;;  %v753_v37 = vmul.f32 %v733_v30, %v733_v30  ;;  %v765_v55 = vsub.f32 %v2188_v11, %v733_v30  ;;  %v763_v62 = vsub.f32 %v2186_v19, %v731_v27 }
 0x520   :  { %v746_v28 = vpop.xlane.xlu0 %745  ;;  %v740_v29 = vpop.xlane.xlu1 %739 }
 0x521   :  { %v750_v6 = vmul.f32 0.0078125, %v746_v28  ;;  %v747_v31 = vmul.f32 0.0078125, %v740_v29 }
 0x523   :  { %v758_v33 = vsub.f32 %v750_v6, %v754_v4  ;;  %v755_v34 = vsub.f32 %v747_v31, %v751_v32 }
 0x524   :  { %v744_v35 = vpop.xlane.xlu0 %743 }
 0x525   :  { %v762_v38 = vmax.f32 %v758_v33, 0.0  ;;  %v749_v39 = vmul.f32 0.0078125, %v744_v35  ;;  %v759_v42 = vmax.f32 %v755_v34, 0.0 }
 0x527   :  { %v770_v40 = vadd.f32 1e-05, %v762_v38  ;;  %v757_v41 = vsub.f32 %v749_v39, %v753_v37  ;;  %v767_v49 = vadd.f32 1e-05, %v759_v42 }
 0x528   :  { %v742_v43 = vpop.xlane.xlu0 %741 }
 0x529   :  { %1867 = vrsqrt.f32 %v770_v40  ;;  %v761_v45 = vmax.f32 %v757_v41, 0.0  ;;  %v748_v46 = vmul.f32 0.0078125, %v742_v43 }
 0x52b   :  { %v769_v47 = vadd.f32 1e-05, %v761_v45  ;;  %v756_v48 = vsub.f32 %v748_v46, %v752_v44 }
 0x52d   :  { %1869 = vrsqrt.f32 %v769_v47  ;;  %v760_v50 = vmax.f32 %v756_v48, 0.0 }
 0x52e   :  { %1871 = vrsqrt.f32 %v767_v49 }
 0x52f   :  { %v768_v51 = vadd.f32 1e-05, %v760_v50 }
 0x531   :  { %1873 = vrsqrt.f32 %v768_v51 }
 0x536   :  { %v1868_v53 = vpop.eup %1867 }
 0x537   :  { %v778_v54 = vmul.f32 %v1868_v53, %v766_v52 }
 0x539   :  { %1711 = vmatprep.subr.mxu1 %v778_v54 }
 0x53a   :  { %v1870_v57 = vpop.eup %1869  ;;  %1712 = vmatpush3.msra.mxu1 %v778_v54 }
 0x53b   :  { %v777_v58 = vmul.f32 %v1870_v57, %v765_v55  ;;  %v1872_v59 = vpop.eup %1871 }
 0x53c   :  { %v775_v1 = vmul.f32 %v1872_v59, %v763_v62 }
 0x53d   :  { %1713 = vmatprep.subr.mxu1 %v777_v58 }
 0x53e   :  { %v1874_v61 = vpop.eup %1873  ;;  %1714 = vmatpush3.msra.mxu1 %v777_v58 }
 0x53f   :  { %v776_v63 = vmul.f32 %v1874_v61, %v764_v60 }
 0x541   :  { %1715 = vmatprep.subr.mxu1 %v776_v63 }
 0x542   :  { %1716 = vmatpush3.msra.mxu1 %v776_v63 }
 0x543   :  { %1717 = vmatprep.subr.mxu1 %v775_v1 }
 0x544   :  { %1718 = vmatpush3.msra.mxu1 %v775_v1 }
 0x545   :  { %1720 = vmatmul.mubr.msk.f32.vlgmr.msra.gmra.mxu1 %vm150_vm0, %v1562_v2 }
 0x546   :  { %1722 = vmatprep.mubr.msk.f32.mxu1 %vm150_vm0, %v1563_v5 }
 0x549   :  { %1723 = vmatmul.mubr.msk.f32.gmra.mxu1 %vm150_vm0, %v1564_v8 }
 0x605   :  { %v2220_v17 = vpop.f32.mrf.mxu1 }
 0x606   :  { %883 = vadd.xlane.f32.xlu1 %v2220_v17  ;;  %v894_v0 = vmul.f32 %v2220_v17, %v2220_v17 }
 0x607   :  { %v2225_v18 = vpop.f32.mrf.mxu1 }
 0x608   :  { %899 = vadd.xlane.f32.xlu0 %v894_v0  ;;  %v893_v14 = vmul.f32 %v2225_v18, %v2225_v18 }
 0x609   :  { %v2228_v7 = vpop.f32.mrf.mxu1 }
 0x60a   :  { %881 = vadd.xlane.f32.xlu1 %v2225_v18  ;;  %v896_v20 = vmul.f32 %v2228_v7, %v2228_v7 }
 0x60b   :  { %v2235_v21 = vpop.f32.mrf.mxu1 }
 0x60c   :  { %887 = vadd.xlane.f32.xlu0 %v2228_v7  ;;  %v895_v22 = vmul.f32 %v2235_v21, %v2235_v21 }
 0x60e   :  { %897 = vadd.xlane.f32.xlu1 %v893_v14 }
 0x610   :  { %903 = vadd.xlane.f32.xlu0 %v896_v20 }
 0x612   :  { %885 = vadd.xlane.f32.xlu1 %v2235_v21 }
 0x614   :  { %901 = vadd.xlane.f32.xlu0 %v895_v22 }
 0x623   :  { %946 = vperm.xlu1 %1814, %v2015_v9  }
 0x627   :  { %1815 = vset.pattern.permute.xlu1 %v1937_v3 }
 0x628   :  { %970 = vperm.xlu1 %1815, %v2021_v10  }
 0x62a   :  { %950 = vperm.xlu0 %1813, %v2021_v10  }
 0x62c   :  { %1816 = vset.pattern.permute.xlu1 %v1936_v15 }
 0x62d   :  { %942 = vperm.xlu1 %1816, %v2028_v12  }
 0x631   :  { %1817 = vset.pattern.permute.xlu1 %v1937_v3 }
 0x632   :  { %966 = vperm.xlu1 %1817, %v2015_v9  }
 0x636   :  { %1818 = vset.pattern.permute.xlu1 %v1936_v15 }
 0x637   :  { %938 = vperm.xlu1 %1818, %v2035_v13  }
 0x63b   :  { %1819 = vset.pattern.permute.xlu1 %v1937_v3 }
 0x63c   :  { %962 = vperm.xlu1 %1819, %v2028_v12  }
 0x640   :  { %958 = vperm.xlu1 %1819, %v2035_v13  }
 0x68f   :  { %v884_v10 = vpop.xlane.xlu1 %883 }
 0x690   :  { %v890_v24 = vmul.f32 0.0078125, %v884_v10 }
 0x691   :  { %v900_v25 = vpop.xlane.xlu0 %899 }
 0x692   :  { %v910_v26 = vmul.f32 %v890_v24, %v890_v24  ;;  %v906_v27 = vmul.f32 0.0078125, %v900_v25  ;;  %v922_v59 = vsub.f32 %v2220_v17, %v890_v24 }
 0x693   :  { %v882_v9 = vpop.xlane.xlu1 %881 }
 0x694   :  { %v914_v28 = vsub.f32 %v906_v27, %v910_v26  ;;  %v889_v4 = vmul.f32 0.0078125, %v882_v9 }
 0x695   :  { %v888_v29 = vpop.xlane.xlu0 %887 }
 0x696   :  { %v892_v30 = vmul.f32 0.0078125, %v888_v29  ;;  %v918_v31 = vmax.f32 %v914_v28, 0.0  ;;  %v909_v32 = vmul.f32 %v889_v4, %v889_v4  ;;  %v921_v0 = vsub.f32 %v2225_v18, %v889_v4  ;;  %v1570_v4 = vld [vmem:[%s2426_s4 + $0x48] sm:$0xff] }
 0x697   :  { %v898_v6 = vpop.xlane.xlu1 %897 }
 0x698   :  { %v905_v12 = vmul.f32 0.0078125, %v898_v6  ;;  %v912_v33 = vmul.f32 %v892_v30, %v892_v30  ;;  %v926_v39 = vadd.f32 1e-05, %v918_v31  ;;  %v924_v55 = vsub.f32 %v2228_v7, %v892_v30  ;;  %v1571_v30 = vld [vmem:[%s2426_s4 + $0x50] sm:$0xff]  ;;  %v1572_v6 = vld [vmem:[%s2426_s4 + $0x58] sm:$0xff] }
 0x699   :  { %v904_v13 = vpop.xlane.xlu0 %903 }
 0x69a   :  { %v908_v34 = vmul.f32 0.0078125, %v904_v13  ;;  %v913_v36 = vsub.f32 %v905_v12, %v909_v32  ;;  %1875 = vrsqrt.f32 %v926_v39  ;;  %v1938_v12 = vmov 9   ;;  %v2306_v39 = vld [vmem:[%s2424_s2 + $0x8] sm:$0xff] }
 0x69b   :  { %v886_v35 = vpop.xlane.xlu1 %885  ;;  %1820 = vset.pattern.permute.xlu1 %v1938_v12  ;;  %1821 = vset.pattern.permute.xlu0 %v1938_v12 }
 0x69c   :  { %v916_v37 = vsub.f32 %v908_v34, %v912_v33  ;;  %v891_v38 = vmul.f32 0.0078125, %v886_v35  ;;  %v917_v45 = vmax.f32 %v913_v36, 0.0 }
 0x69d   :  { %v902_v40 = vpop.xlane.xlu0 %901 }
 0x69e   :  { %v920_v41 = vmax.f32 %v916_v37, 0.0  ;;  %v911_v42 = vmul.f32 %v891_v38, %v891_v38  ;;  %v907_v43 = vmul.f32 0.0078125, %v902_v40  ;;  %v925_v50 = vadd.f32 1e-05, %v917_v45  ;;  %v2299_v37 = vld [vmem:[%s2424_s2 + $0x18] sm:$0xff]  ;;  %v2312_v40 = vld [vmem:[%s2424_s2 + $0x10] sm:$0xff] }
 0x69f   :  { %v947_v44 = vpop.permute.xlu1 %946  ;;  %v923_v1 = vsub.f32 %v2235_v21, %v891_v38  ;;  %v1939_v38 = vmov 10  }
 0x6a0   :  { %v928_v46 = vadd.f32 1e-05, %v920_v41  ;;  %v915_v47 = vsub.f32 %v907_v43, %v911_v42  ;;  %v2319_v41 = vld [vmem:[%s2424_s2] sm:$0xff] }
 0x6a1   :  { %v1577_v43 = vld [vmem:[%s2426_s4 + $0x60] sm:$0xff] }
 0x6a2   :  { %1877 = vrsqrt.f32 %v928_v46  ;;  %v919_v48 = vmax.f32 %v915_v47, 0.0  ;;  %1747 = vmatprep.mubr.msk.f32.mxu1 %vm150_vm0, %v1577_v43 }
 0x6a3   :  { %v971_v49 = vpop.permute.xlu1 %970 }
 0x6a4   :  { %v927_v51 = vadd.f32 1e-05, %v919_v48 }
 0x6a5   :  { %v951_v58 = vpop.permute.xlu0 %950 }
 0x6a6   :  { %1879 = vrsqrt.f32 %v927_v51 }
 0x6a7   :  { %1881 = vrsqrt.f32 %v925_v50  ;;  %v1876_v54 = vpop.eup %1875 }
 0x6a8   :  { %v943_v52 = vpop.permute.xlu1 %942  ;;  %v934_v61 = vmul.f32 %v1876_v54, %v922_v59 }
 0x6aa   :  { %v954_v14 = vmul.f32 %v943_v52, %v934_v61 }
 0x6ad   :  { %v967_v53 = vpop.permute.xlu1 %966 }
 0x6af   :  { %v1878_v57 = vpop.eup %1877 }
 0x6b0   :  { %v936_v60 = vmul.f32 %v1878_v57, %v924_v55 }
 0x6b2   :  { %v956_v62 = vmul.f32 %v951_v58, %v936_v60  ;;  %v939_v63 = vpop.permute.xlu1 %938 }
 0x6b3   :  { %v1880_v2 = vpop.eup %1879 }
 0x6b4   :  { %v976_v5 = vadd.f32 %v971_v49, %v956_v62  ;;  %v1882_v8 = vpop.eup %1881  ;;  %v935_v15 = vmul.f32 %v1880_v2, %v923_v1 }
 0x6b5   :  { %v933_v3 = vmul.f32 %v1882_v8, %v921_v0 }
 0x6b6   :  { %v980_v20 = vmax.f32 %v976_v5, 0.0  ;;  %v955_v22 = vmul.f32 %v947_v44, %v935_v15 }
 0x6b7   :  { %v963_v7 = vpop.permute.xlu1 %962  ;;  %v953_v24 = vmul.f32 %v939_v63, %v933_v3 }
 0x6b8   :  { %v974_v23 = vadd.f32 %v963_v7, %v954_v14  ;;  %v2257_v17 = vadd.f32 %v980_v20, %v2183_v16  ;;  %v975_v10 = vadd.f32 %v967_v53, %v955_v22 }
 0x6ba   :  { %1725 = vmatprep.subr.mxu0 %v2257_v17  ;;  %v979_v21 = vmax.f32 %v975_v10, 0.0  ;;  %v978_v25 = vmax.f32 %v974_v23, 0.0 }
 0x6bb   :  { %v959_v26 = vpop.permute.xlu1 %958  ;;  %1726 = vmatpush3.msra.mxu0 %v2257_v17 }
 0x6bc   :  { %v973_v27 = vadd.f32 %v959_v26, %v953_v24  ;;  %v2262_v18 = vadd.f32 %v979_v21, %v2188_v11  ;;  %v2265_v28 = vadd.f32 %v978_v25, %v2177_v56 }
 0x6be   :  { %v977_v9 = vmax.f32 %v973_v27, 0.0  ;;  %1727 = vmatprep.subr.mxu0 %v2262_v18 }
 0x6bf   :  { %1728 = vmatpush3.msra.mxu0 %v2262_v18 }
 0x6c0   :  { %v2269_v29 = vadd.f32 %v977_v9, %v2186_v19  ;;  %1729 = vmatprep.subr.mxu0 %v2265_v28 }
 0x6c1   :  { %1730 = vmatpush3.msra.mxu0 %v2265_v28 }
 0x6c2   :  { %1731 = vmatprep.subr.mxu0 %v2269_v29 }
 0x6c3   :  { %1732 = vmatpush3.msra.mxu0 %v2269_v29 }
 0x6c4   :  { %1734 = vmatmul.mubr.msk.f32.vlgmr.msra.gmra.mxu0 %vm150_vm0, %v1570_v4 }
 0x6c5   :  { %1736 = vmatprep.mubr.msk.f32.mxu0 %vm150_vm0, %v1571_v30 }
 0x6c8   :  { %1737 = vmatmul.mubr.msk.f32.gmra.mxu0 %vm150_vm0, %v1572_v6 }
 0x784   :  { %v1735_v31 = vpop.f32.mrf.mxu0 }
 0x785   :  { %v1100_v13 = vmul.f32 %v1735_v31, %v1735_v31  ;;  %1089 = vadd.xlane.f32.xlu0 %v1735_v31 }
 0x786   :  { %v2288_v32 = vpop.f32.mrf.mxu0 }
 0x787   :  { %1105 = vadd.xlane.f32.xlu1 %v1100_v13  ;;  %v1099_v36 = vmul.f32 %v2288_v32, %v2288_v32 }
 0x788   :  { %v1738_v33 = vpop.f32.mrf.mxu0 }
 0x789   :  { %1087 = vadd.xlane.f32.xlu0 %v2288_v32  ;;  %v1102_v35 = vmul.f32 %v1738_v33, %v1738_v33 }
 0x78a   :  { %v2291_v34 = vpop.f32.mrf.mxu0 }
 0x78b   :  { %1093 = vadd.xlane.f32.xlu1 %v1738_v33  ;;  %v1101_v42 = vmul.f32 %v2291_v34, %v2291_v34 }
 0x78d   :  { %1091 = vadd.xlane.f32.xlu0 %v2291_v34 }
 0x791   :  { %1109 = vadd.xlane.f32.xlu0 %v1102_v35 }
 0x795   :  { %1103 = vadd.xlane.f32.xlu0 %v1099_v36 }
 0x79c   :  { %1156 = vperm.xlu1 %1820, %v2299_v37  }
 0x7a0   :  { %1822 = vset.pattern.permute.xlu1 %v1939_v38 }
 0x7a1   :  { %1176 = vperm.xlu1 %1822, %v2299_v37  }
 0x7a5   :  { %1823 = vset.pattern.permute.xlu1 %v1938_v12 }
 0x7a6   :  { %1148 = vperm.xlu1 %1823, %v2306_v39  }
 0x7aa   :  { %1824 = vset.pattern.permute.xlu1 %v1939_v38 }
 0x7ab   :  { %1172 = vperm.xlu1 %1824, %v2312_v40   ;;  %1152 = vperm.xlu0 %1821, %v2312_v40  }
 0x7af   :  { %1825 = vset.pattern.permute.xlu1 %v1938_v12 }
 0x7b0   :  { %1144 = vperm.xlu1 %1825, %v2319_v41  }
 0x7b4   :  { %1826 = vset.pattern.permute.xlu1 %v1939_v38 }
 0x7d4   :  { %1107 = vadd.xlane.f32.xlu1 %v1101_v42 }
 0x7e5   :  { %1168 = vperm.xlu1 %1826, %v2306_v39  }
 0x7e9   :  { %1164 = vperm.xlu1 %1826, %v2319_v41  }
 0x80e   :  { %v1090_v44 = vpop.xlane.xlu0 %1089 }
 0x80f   :  { %v1096_v45 = vmul.f32 0.0078125, %v1090_v44 }
 0x810   :  { %v1106_v46 = vpop.xlane.xlu1 %1105 }
 0x811   :  { %v1116_v47 = vmul.f32 %v1096_v45, %v1096_v45  ;;  %v1112_v48 = vmul.f32 0.0078125, %v1106_v46  ;;  %v1128_v63 = vsub.f32 %v1735_v31, %v1096_v45 }
 0x812   :  { %v1088_v49 = vpop.xlane.xlu0 %1087 }
 0x813   :  { %v1120_v50 = vsub.f32 %v1112_v48, %v1116_v47  ;;  %v1095_v21 = vmul.f32 0.0078125, %v1088_v49 }
 0x814   :  { %v1094_v51 = vpop.xlane.xlu1 %1093 }
 0x815   :  { %v1124_v52 = vmax.f32 %v1120_v50, 0.0  ;;  %v1098_v55 = vmul.f32 0.0078125, %v1094_v51  ;;  %v1115_v26 = vmul.f32 %v1095_v21, %v1095_v21  ;;  %v1127_v43 = vsub.f32 %v2288_v32, %v1095_v21 }
 0x816   :  { %v1092_v53 = vpop.xlane.xlu0 %1091 }
 0x817   :  { %v1132_v54 = vadd.f32 1e-05, %v1124_v52  ;;  %v1118_v58 = vmul.f32 %v1098_v55, %v1098_v55  ;;  %v1130_v8 = vsub.f32 %v1738_v33, %v1098_v55  ;;  %v1097_v6 = vmul.f32 0.0078125, %v1092_v53 }
 0x818   :  { %v1157_v5 = vpop.permute.xlu1 %1156 }
 0x819   :  { %1883 = vrsqrt.f32 %v1132_v54  ;;  %v1117_v13 = vmul.f32 %v1097_v6, %v1097_v6  ;;  %v1129_v45 = vsub.f32 %v2291_v34, %v1097_v6 }
 0x81a   :  { %v1110_v57 = vpop.xlane.xlu0 %1109 }
 0x81b   :  { %v1114_v59 = vmul.f32 0.0078125, %v1110_v57 }
 0x81c   :  { %v1177_v20 = vpop.permute.xlu1 %1176 }
 0x81d   :  { %v1122_v60 = vsub.f32 %v1114_v59, %v1118_v58 }
 0x81e   :  { %v1104_v10 = vpop.xlane.xlu0 %1103 }
 0x81f   :  { %v1126_v61 = vmax.f32 %v1122_v60, 0.0  ;;  %v1111_v25 = vmul.f32 0.0078125, %v1104_v10 }
 0x821   :  { %v1134_v62 = vadd.f32 1e-05, %v1126_v61  ;;  %v1149_v24 = vpop.permute.xlu1 %1148  ;;  %v1119_v9 = vsub.f32 %v1111_v25, %v1115_v26 }
 0x823   :  { %1885 = vrsqrt.f32 %v1134_v62  ;;  %v1123_v4 = vmax.f32 %v1119_v9, 0.0 }
 0x825   :  { %v1131_v12 = vadd.f32 1e-05, %v1123_v4 }
 0x826   :  { %v1884_v1 = vpop.eup %1883  ;;  %v1173_v27 = vpop.permute.xlu1 %1172 }
 0x827   :  { %v1140_v2 = vmul.f32 %v1884_v1, %v1128_v63  ;;  %1887 = vrsqrt.f32 %v1131_v12  ;;  %v1153_v49 = vpop.permute.xlu0 %1152  ;;  %v1578_v1 = vld [vmem:[%s2426_s4 + $0x68] sm:$0xff] }
 0x829   :  { %v1160_v46 = vmul.f32 %v1149_v24, %v1140_v2 }
 0x82b   :  { %v1145_v30 = vpop.permute.xlu1 %1144 }
 0x830   :  { %v1886_v15 = vpop.eup %1885 }
 0x831   :  { %v1142_v0 = vmul.f32 %v1886_v15, %v1130_v8 }
 0x833   :  { %v1162_v14 = vmul.f32 %v1157_v5, %v1142_v0 }
 0x834   :  { %v1888_v38 = vpop.eup %1887 }
 0x835   :  { %v1182_v22 = vadd.f32 %v1177_v20, %v1162_v14  ;;  %v1139_v44 = vmul.f32 %v1888_v38, %v1127_v43  ;;  %v1941_v20 = vmov 12  }
 0x837   :  { %v1186_v7 = vmax.f32 %v1182_v22, 0.0  ;;  %v1159_v50 = vmul.f32 %v1145_v30, %v1139_v44 }
 0x839   :  { %v1190_v3 = vadd.f32 %v1186_v7, %v2257_v17  ;;  %v1587_v7 = vld [vmem:[%s2426_s4 + $0x90] sm:$0xff] }
 0x83b   :  { %v1194_v23 = vadd.f32 %v1190_v3, %v2183_v16 }
 0x83d   :  { %1739 = vmatprep.subr.mxu1 %v1194_v23 }
 0x83e   :  { %1740 = vmatpush3.msra.mxu1 %v1194_v23 }
 0x85d   :  { %v1108_v31 = vpop.xlane.xlu1 %1107 }
 0x85e   :  { %v1113_v33 = vmul.f32 0.0078125, %v1108_v31 }
 0x860   :  { %v1121_v17 = vsub.f32 %v1113_v33, %v1117_v13 }
 0x861   :  { %v1169_v42 = vpop.permute.xlu1 %1168 }
 0x862   :  { %v1125_v35 = vmax.f32 %v1121_v17, 0.0  ;;  %v1180_v51 = vadd.f32 %v1169_v42, %v1160_v46 }
 0x864   :  { %v1133_v36 = vadd.f32 1e-05, %v1125_v35  ;;  %v1184_v55 = vmax.f32 %v1180_v51, 0.0 }
 0x865   :  { %v1165_v48 = vpop.permute.xlu1 %1164 }
 0x866   :  { %1889 = vrsqrt.f32 %v1133_v36  ;;  %v1179_v53 = vadd.f32 %v1165_v48, %v1159_v50  ;;  %v1188_v60 = vadd.f32 %v1184_v55, %v2265_v28  ;;  %v1580_v28 = vld [vmem:[%s2426_s4 + $0x78] sm:$0xff] }
 0x868   :  { %v1183_v58 = vmax.f32 %v1179_v53, 0.0  ;;  %v1192_v62 = vadd.f32 %v1188_v60, %v2177_v56 }
 0x86a   :  { %v1187_v61 = vadd.f32 %v1183_v58, %v2269_v29  ;;  %v1940_v29 = vmov 11  }
 0x86b   :  { %1827 = vset.pattern.permute.xlu1 %v1940_v29  ;;  %1828 = vset.pattern.permute.xlu0 %v1940_v29 }
 0x86c   :  { %v1191_v63 = vadd.f32 %v1187_v61, %v2186_v19 }
 0x873   :  { %v1890_v47 = vpop.eup %1889 }
 0x874   :  { %v1141_v52 = vmul.f32 %v1890_v47, %v1129_v45 }
 0x876   :  { %v1161_v54 = vmul.f32 %v1153_v49, %v1141_v52 }
 0x878   :  { %v1181_v57 = vadd.f32 %v1173_v27, %v1161_v54 }
 0x87a   :  { %v1185_v59 = vmax.f32 %v1181_v57, 0.0 }
 0x87c   :  { %v1189_v32 = vadd.f32 %v1185_v59, %v2262_v18  ;;  %v1579_v18 = vld [vmem:[%s2426_s4 + $0x70] sm:$0xff] }
 0x87e   :  { %v1193_v34 = vadd.f32 %v1189_v32, %v2188_v11 }
 0x880   :  { %1741 = vmatprep.subr.mxu1 %v1193_v34 }
 0x881   :  { %1742 = vmatpush3.msra.mxu1 %v1193_v34 }
 0x882   :  { %1743 = vmatprep.subr.mxu1 %v1192_v62 }
 0x883   :  { %1744 = vmatpush3.msra.mxu1 %v1192_v62 }
 0x884   :  { %1745 = vmatprep.subr.mxu1 %v1191_v63 }
 0x885   :  { %1746 = vmatpush3.msra.mxu1 %v1191_v63 }
 0x886   :  { %1748 = vmatmul.mubr.msk.f32.vlgmr.msra.gmra.mxu1 %vm150_vm0, %v1578_v1 }
 0x887   :  { %1750 = vmatprep.mubr.msk.f32.mxu1 %vm150_vm0, %v1579_v18 }
 0x88a   :  { %1751 = vmatmul.mubr.msk.f32.gmra.mxu1 %vm150_vm0, %v1580_v28 }
 0x88b   :  { %1764 = vmatprep.mubr.msk.f32.mxu1 %vm150_vm0, %v1587_v7 }
 0x946   :  { %v2352_v2 = vpop.f32.mrf.mxu1 }
 0x947   :  { %v1310_v5 = vmul.f32 %v2352_v2, %v2352_v2  ;;  %1299 = vadd.xlane.f32.xlu0 %v2352_v2 }
 0x948   :  { %v2357_v8 = vpop.f32.mrf.mxu1 }
 0x949   :  { %1315 = vadd.xlane.f32.xlu1 %v1310_v5  ;;  %v1309_v14 = vmul.f32 %v2357_v8, %v2357_v8 }
 0x94a   :  { %v2359_v15 = vpop.f32.mrf.mxu1 }
 0x94b   :  { %1297 = vadd.xlane.f32.xlu0 %v2357_v8  ;;  %v1312_v22 = vmul.f32 %v2359_v15, %v2359_v15 }
 0x94c   :  { %v2363_v0 = vpop.f32.mrf.mxu1 }
 0x94d   :  { %1303 = vadd.xlane.f32.xlu1 %v2359_v15 }
 0x94f   :  { %1301 = vadd.xlane.f32.xlu0 %v2363_v0 }
 0x953   :  { %1313 = vadd.xlane.f32.xlu0 %v1309_v14 }
 0x95e   :  { %1366 = vperm.xlu1 %1827, %v2299_v37  }
 0x962   :  { %1829 = vset.pattern.permute.xlu1 %v1941_v20 }
 0x963   :  { %1386 = vperm.xlu1 %1829, %v2299_v37   ;;  %v1311_v37 = vmul.f32 %v2363_v0, %v2363_v0 }
 0x967   :  { %1830 = vset.pattern.permute.xlu1 %v1940_v29 }
 0x968   :  { %1358 = vperm.xlu1 %1830, %v2306_v39  }
 0x969   :  { %1362 = vperm.xlu0 %1828, %v2312_v40  }
 0x96c   :  { %1831 = vset.pattern.permute.xlu1 %v1941_v20 }
 0x96d   :  { %1382 = vperm.xlu1 %1831, %v2312_v40   ;;  %1834 = vset.pattern.permute.xlu0 %v1941_v20  ;;  %v1585_v40 = vld [vmem:[%s2426_s4 + $0x80] sm:$0xff] }
 0x96e   :  { %1761 = vmatprep.mubr.msk.f32.mxu0 %vm150_vm0, %v1585_v40 }
 0x971   :  { %1832 = vset.pattern.permute.xlu1 %v1940_v29 }
 0x972   :  { %1354 = vperm.xlu1 %1832, %v2319_v41  }
 0x976   :  { %1833 = vset.pattern.permute.xlu1 %v1941_v20 }
 0x996   :  { %1319 = vadd.xlane.f32.xlu1 %v1312_v22 }
 0x99a   :  { %1317 = vadd.xlane.f32.xlu1 %v1311_v37 }
 0x9ab   :  { %1378 = vperm.xlu1 %1833, %v2306_v39  }
 0x9af   :  { %1374 = vperm.xlu1 %1833, %v2319_v41  }
 0x9d0   :  { %v1300_v10 = vpop.xlane.xlu0 %1299 }
 0x9d1   :  { %v1306_v41 = vmul.f32 0.0078125, %v1300_v10 }
 0x9d2   :  { %v1316_v3 = vpop.xlane.xlu1 %1315 }
 0x9d3   :  { %v1326_v9 = vmul.f32 %v1306_v41, %v1306_v41  ;;  %v1322_v4 = vmul.f32 0.0078125, %v1316_v3  ;;  %v1338_v59 = vsub.f32 %v2352_v2, %v1306_v41 }
 0x9d4   :  { %v1298_v21 = vpop.xlane.xlu0 %1297 }
 0x9d5   :  { %v1305_v30 = vmul.f32 0.0078125, %v1298_v21  ;;  %v1330_v31 = vsub.f32 %v1322_v4, %v1326_v9 }
 0x9d6   :  { %v1304_v23 = vpop.xlane.xlu1 %1303 }
 0x9d7   :  { %v1325_v13 = vmul.f32 %v1305_v30, %v1305_v30  ;;  %v1334_v17 = vmax.f32 %v1330_v31, 0.0  ;;  %v1308_v36 = vmul.f32 0.0078125, %v1304_v23  ;;  %v1337_v61 = vsub.f32 %v2357_v8, %v1305_v30  ;;  %v1904_v30 = vld [vmem:[%s2422_s0 + $0x10] sm:$0xff]  ;;  %v1906_v31 = vld [vmem:[%s2422_s0] sm:$0xff] }
 0x9d8   :  { %v1302_v25 = vpop.xlane.xlu0 %1301 }
 0x9d9   :  { %v1342_v42 = vadd.f32 1e-05, %v1334_v17  ;;  %v1328_v44 = vmul.f32 %v1308_v36, %v1308_v36  ;;  %v1307_v45 = vmul.f32 0.0078125, %v1302_v25  ;;  %v1340_v62 = vsub.f32 %v2359_v15, %v1308_v36  ;;  %v1588_v17 = vld [vmem:[%s2426_s4 + $0x98] sm:$0xff] }
 0x9da   :  { %v1367_v24 = vpop.permute.xlu1 %1366 }
 0x9db   :  { %1891 = vrsqrt.f32 %v1342_v42  ;;  %v1327_v50 = vmul.f32 %v1307_v45, %v1307_v45  ;;  %v1339_v5 = vsub.f32 %v2363_v0, %v1307_v45  ;;  %v1402_v0 = vstv %s2427_s5 }
 0x9dc   :  { %v1314_v27 = vpop.xlane.xlu0 %1313 }
 0x9dd   :  { %v1321_v6 = vmul.f32 0.0078125, %v1314_v27 }
 0x9de   :  { %v1387_v39 = vpop.permute.xlu1 %1386 }
 0x9df   :  { %v1329_v33 = vsub.f32 %v1321_v6, %v1325_v13  ;;  %v1905_v6 = vld [vmem:[%s2422_s0 + $0x8] sm:$0xff] }
 0x9e1   :  { %v1333_v38 = vmax.f32 %v1329_v33, 0.0  ;;  %v1586_v33 = vld [vmem:[%s2426_s4 + $0x88] sm:$0xff] }
 0x9e3   :  { %v1359_v26 = vpop.permute.xlu1 %1358  ;;  %v1341_v46 = vadd.f32 1e-05, %v1333_v38 }
 0x9e4   :  { %v1363_v40 = vpop.permute.xlu0 %1362 }
 0x9e5   :  { %1893 = vrsqrt.f32 %v1341_v46 }
 0x9e8   :  { %v1383_v12 = vpop.permute.xlu1 %1382  ;;  %v1892_v58 = vpop.eup %1891 }
 0x9e9   :  { %v1350_v34 = vmul.f32 %v1892_v58, %v1338_v59 }
 0x9eb   :  { %v1370_v18 = vmul.f32 %v1359_v26, %v1350_v34 }
 0x9ed   :  { %v1355_v35 = vpop.permute.xlu1 %1354 }
 0x9f2   :  { %v1894_v60 = vpop.eup %1893 }
 0x9f3   :  { %v1349_v63 = vmul.f32 %v1894_v60, %v1337_v61 }
 0x9f5   :  { %v1369_v14 = vmul.f32 %v1355_v35, %v1349_v63 }
 0xa1f   :  { %v1320_v43 = vpop.xlane.xlu1 %1319 }
 0xa20   :  { %v1324_v47 = vmul.f32 0.0078125, %v1320_v43 }
 0xa22   :  { %v1332_v48 = vsub.f32 %v1324_v47, %v1328_v44 }
 0xa23   :  { %v1318_v49 = vpop.xlane.xlu1 %1317 }
 0xa24   :  { %v1336_v51 = vmax.f32 %v1332_v48, 0.0  ;;  %v1323_v52 = vmul.f32 0.0078125, %v1318_v49 }
 0xa26   :  { %v1344_v53 = vadd.f32 1e-05, %v1336_v51  ;;  %v1331_v54 = vsub.f32 %v1323_v52, %v1327_v50 }
 0xa27   :  { %v1379_v32 = vpop.permute.xlu1 %1378 }
 0xa28   :  { %1895 = vrsqrt.f32 %v1344_v53  ;;  %v1335_v55 = vmax.f32 %v1331_v54, 0.0  ;;  %v1390_v20 = vadd.f32 %v1379_v32, %v1370_v18 }
 0xa2a   :  { %v1343_v57 = vadd.f32 1e-05, %v1335_v55  ;;  %v1394_v8 = vadd.f32 %v1390_v20, %v2177_v56  ;;  %v1903_v56 = vld [vmem:[%s2422_s0 + $0x18] sm:$0xff]  ;;  %s1942_s0 = smov [#allocation3]  }
 0xa2b   :  { %v1375_v29 = vpop.permute.xlu1 %1374  ;;  %s1522_s30 = sshll.u32 %s1942_s0, 4  ;;  %s1523_s30 = int_to_ptr.vmem [resolvable:$true] %s1522_s30 }
 0xa2c   :  { %1897 = vrsqrt.f32 %v1343_v57  ;;  %v1389_v2 = vadd.f32 %v1375_v29, %v1369_v14  ;;  %v1398_v41 = vmax.f32 %v1394_v8, 0.0  ;;  %s1907_s4 = scalar_lea.vmem %s1523_s30, 512  ;;  %p1912_p1 = scmp.lt.s32.totalorder %s1523_s30, %s1523_s30 }
 0xa2d   :  { %p1908_p0 = scmp.ne.s32.totalorder %s1523_s30, %s1907_s4  ;;  %p1913_p2 = scmp.lt.s32.totalorder %s1907_s4, %s1907_s4 }
 0xa2e   :  { %v1393_v10 = vadd.f32 %v1389_v2, %v2186_v19 }
 0xa2f   :  { %p1914_p3 = por %p1913_p2, %p1912_p1 }
 0xa30   :  { %v1397_v27 = vmax.f32 %v1393_v10, 0.0 }
 0xa31   :  { %p1915_p4 = pnand %p1914_p3, %p1908_p0 }
 0xa32   :  { %v1403_v19 = vmul.f32 %v1402_v0, %v1397_v27 }
 0xa34   :  { %v1407_v13 = vadd.f32 %v1906_v31, %v1403_v19 }
 0xa35   :  { %v1896_v1 = vpop.eup %1895 }
 0xa36   :  { %v1352_v28 = vmul.f32 %v1896_v1, %v1340_v62 }
 0xa38   :  { %v1372_v22 = vmul.f32 %v1367_v24, %v1352_v28 }
 0xa39   :  { %v1898_v37 = vpop.eup %1897 }
 0xa3a   :  { %v1351_v7 = vmul.f32 %v1898_v37, %v1339_v5  ;;  %v1392_v3 = vadd.f32 %v1387_v39, %v1372_v22 }
 0xa3c   :  { %v1371_v23 = vmul.f32 %v1363_v40, %v1351_v7  ;;  %v1396_v15 = vadd.f32 %v1392_v3, %v2183_v16  ;;  %v1404_v16 = vmul.f32 %v1402_v0, %v1398_v41 }
 0xa3e   :  { %v1391_v21 = vadd.f32 %v1383_v12, %v1371_v23  ;;  %v1400_v25 = vmax.f32 %v1396_v15, 0.0  ;;  %v1408_v12 = vadd.f32 %v1905_v6, %v1404_v16 }
 0xa40   :  { %v1395_v24 = vadd.f32 %v1391_v21, %v2188_v11  ;;  %v1406_v26 = vmul.f32 %v1402_v0, %v1400_v25 }
 0xa42   :  { %v1399_v9 = vmax.f32 %v1395_v24, 0.0  ;;  %v1410_v39 = vadd.f32 %v1903_v56, %v1406_v26 }
 0xa44   :  { %v1405_v4 = vmul.f32 %v1402_v0, %v1399_v9  ;;  %1753 = vmatprep.subr.mxu0 %v1410_v39  ;;  %1767 = vmatprep.subr.mxu1 %v1410_v39 }
 0xa45   :  { %1754 = vmatpush3.msra.mxu0 %v1410_v39  ;;  %1771 = vmatpush3.msra.mxu1 %v1410_v39 }
 0xa46   :  { %v1409_v11 = vadd.f32 %v1904_v30, %v1405_v4 }
 0xa48   :  { %1755 = vmatprep.subr.mxu0 %v1409_v11  ;;  %1768 = vmatprep.subr.mxu1 %v1409_v11 }
 0xa49   :  { %1756 = vmatpush3.msra.mxu0 %v1409_v11  ;;  %1772 = vmatpush3.msra.mxu1 %v1409_v11 }
 0xa4a   :  { %1757 = vmatprep.subr.mxu0 %v1408_v12  ;;  %1769 = vmatprep.subr.mxu1 %v1408_v12 }
 0xa4b   :  { %1758 = vmatpush3.msra.mxu0 %v1408_v12  ;;  %1773 = vmatpush3.msra.mxu1 %v1408_v12 }
 0xa4c   :  { %1759 = vmatprep.subr.mxu0 %v1407_v13  ;;  %1770 = vmatprep.subr.mxu1 %v1407_v13 }
 0xa4d   :  { %1760 = vmatpush3.msra.mxu0 %v1407_v13  ;;  %1774 = vmatpush3.msra.mxu1 %v1407_v13 }
 0xa4e   :  { %1762 = vmatmul.mubr.msk.f32.vlgmr.msra.gmra.mxu0 %vm150_vm0, %v1586_v33  ;;  %1765 = vmatmul.mubr.msk.f32.vlgmr.msra.gmra.mxu1 %vm150_vm0, %v1588_v17 }
 0xb0e   :  { %v1763_v35 = vpop.f32.mrf.mxu0  ;;  %v1766_v36 = vpop.f32.mrf.mxu1 }
 0xb0f   :  { %1514 = vst [vmem:[#allocation3 + $0x8] sm:$0xff] %v1763_v35  ;;  %1516 = vst [vmem:[#allocation3 + $0x18] sm:$0xff] %v1766_v36 }
 0xb10   :  { %v1494_v38 = vpop.f32.mrf.mxu0  ;;  %v1504_v42 = vpop.f32.mrf.mxu1 }
 0xb11   :  { %1513 = vst [vmem:[#allocation3] sm:$0xff] %v1494_v38  ;;  %1515 = vst [vmem:[#allocation3 + $0x10] sm:$0xff] %v1504_v42 }
 0xb12   :  { %1918 = shalt.err (!%p1915_p4)
}
 0xb13   :  { %s1943_s1 = smov 128   ;;  %s1944_s7 = smov 8  }
 0xb14   :  { %1528 = dma.vmem_to_hbm [thread:$0]  %s1523_s30, 512, %s2428_s6, [#allocation4], %s1943_s1, %s1943_s1, %s1944_s7  }
 0xb15   :  { %1927 = dma.done.wait [#allocation4], 512  }
 0xb16   :  { %1928 = vsyncadd [#allocation4], 4294966784 }
 0xb17   :  { %1532 = vsyncpa [#allocation4], 1 }

</bundles_post_ra>
